<compile_context>
chip_gen: v5e
topology: v5e:2x2
jax: 0.10.0
libtpu: 0.0.40
codegen_flags: <defaults>
</compile_context>

<pallas_src>
import functools
import math

import jax
import jax.numpy as jnp
import numpy as np
from jax.experimental import pallas as pl
from jax.experimental.pallas import tpu as pltpu

LANE = 128   # vreg lane width: channel padding target at the network edges
PAD8 = 8     # replicate-pad halo rounded up to one full sublane tile


def _store_with_halo(dst_ref, src):
    """dst_ref: (8 + t + 8, c) VMEM scratch.

    Rows [8, 8+t) = src, rows [0, 8) = src[0] (top replicate), rows [8+t, 8+t+8)
    = src[t-1] (bottom replicate).  All three stores are sublane-tile aligned.
    """
    t, c = src.shape
    dst_ref[pl.ds(0, PAD8), :] = jnp.broadcast_to(src[0:1, :], (PAD8, c))
    dst_ref[pl.ds(PAD8, t), :] = src
    dst_ref[pl.ds(PAD8 + t, PAD8), :] = jnp.broadcast_to(src[t - 1:t, :], (PAD8, c))


def _conv_from_halo(xp_ref, w_ref, b_ref, *, T, K, relu):
    """Cross-correlation (PyTorch Conv1d) with replicate padding, via K shifted
    MXU matmuls over the halo slab:  out[t] = b + sum_k x[clip(t+k-pad)] @ W[k]."""
    pad = (K - 1) // 2
    xp = xp_ref[...]                                   # (8 + T + 8, Cin), aligned load
    cout = w_ref.shape[-1]
    acc = jnp.zeros((T, cout), jnp.float32)
    for k in range(K):                                 # small static K -> unrolled
        off = PAD8 - pad + k
        acc = acc + jnp.dot(xp[off:off + T, :], w_ref[k],
                            preferred_element_type=jnp.float32)
    acc = acc + b_ref[...]                             # (1, Cout) broadcast
    if relu:
        acc = jnp.maximum(acc, 0.0)
    return acc


def _fused_autoencoder_kernel(x_ref, w1_ref, b1_ref, w2_ref, b2_ref,
                              w3_ref, b3_ref, w4_ref, b4_ref, o_ref,
                              h1, h2, h3, h4, *, T):
    # conv1: Cin=128 (lane-padded from in_dim) -> 128, K=7, pad=3, ReLU
    _store_with_halo(h1, x_ref[0])
    y = _conv_from_halo(h1, w1_ref, b1_ref, T=T, K=7, relu=True)
    # conv2: 128 -> 256, K=5, pad=2, ReLU
    _store_with_halo(h2, y)
    y = _conv_from_halo(h2, w2_ref, b2_ref, T=T, K=5, relu=True)
    # conv3: 256 -> 128, K=3, pad=1, ReLU
    _store_with_halo(h3, y)
    y = _conv_from_halo(h3, w3_ref, b3_ref, T=T, K=3, relu=True)
    # conv4: 128 -> 128 (lane-padded from out_dim), K=3, pad=1, no ReLU
    _store_with_halo(h4, y)
    y = _conv_from_halo(h4, w4_ref, b4_ref, T=T, K=3, relu=False)
    o_ref[0] = y.astype(o_ref.dtype)


@functools.partial(jax.jit, static_argnames=("out_dim",))
def autoencoder_forward(params, vi, imu_w, imu_a, *, out_dim):
    # torch: cat along last dim -> (B, T, in_dim); permutes folded into layout.
    x = jnp.concatenate((vi, imu_w, imu_a), axis=-1)          # (B, T, in_dim)
    B, T, c = x.shape
    assert c <= LANE
    x = jnp.pad(x, ((0, 0), (0, 0), (0, LANE - c)))           # lane-dense (B, T, 128)

    w1, b1 = params["conv1"]
    w2, b2 = params["conv2"]
    w3, b3 = params["conv3"]
    w4, b4 = params["conv4"]

    flops = 2 * B * T * sum(w.shape[0] * w.shape[1] * w.shape[2]
                            for w in (w1, w2, w3, w4))
    bytes_accessed = 4 * (x.size + B * T * LANE
                          + sum(a.size for a in (w1, b1, w2, b2, w3, b3, w4, b4)))

    kernel = functools.partial(_fused_autoencoder_kernel, T=T)
    out = pl.pallas_call(
        kernel,
        out_shape=jax.ShapeDtypeStruct((B, T, LANE), jnp.float32),
        grid_spec=pltpu.PrefetchScalarGridSpec(
            num_scalar_prefetch=0,
            grid=(B,),
            in_specs=[
                pl.BlockSpec((1, T, LANE), lambda i: (i, 0, 0)),
                pl.BlockSpec(w1.shape, lambda i: (0, 0, 0)),   # constant block ->
                pl.BlockSpec(b1.shape, lambda i: (0, 0)),      # weights fetched once,
                pl.BlockSpec(w2.shape, lambda i: (0, 0, 0)),   # stay VMEM-resident
                pl.BlockSpec(b2.shape, lambda i: (0, 0)),
                pl.BlockSpec(w3.shape, lambda i: (0, 0, 0)),
                pl.BlockSpec(b3.shape, lambda i: (0, 0)),
                pl.BlockSpec(w4.shape, lambda i: (0, 0, 0)),
                pl.BlockSpec(b4.shape, lambda i: (0, 0)),
            ],
            out_specs=pl.BlockSpec((1, T, LANE), lambda i: (i, 0, 0)),
            scratch_shapes=[
                pltpu.VMEM((T + 2 * PAD8, LANE), jnp.float32),  # conv1 halo slab
                pltpu.VMEM((T + 2 * PAD8, 128), jnp.float32),   # conv2 halo slab
                pltpu.VMEM((T + 2 * PAD8, 256), jnp.float32),   # conv3 halo slab
                pltpu.VMEM((T + 2 * PAD8, 128), jnp.float32),   # conv4 halo slab
            ],
        ),
        compiler_params=pltpu.CompilerParams(
            dimension_semantics=("parallel",)),   # v7x: one batch per TensorCore
        cost_estimate=pl.CostEstimate(
            flops=flops, transcendentals=0, bytes_accessed=bytes_accessed),
    )(x, w1, b1, w2, b2, w3, b3, w4, b4)
    return out[:, :, :out_dim]                    # strip lane padding of conv4 Cout


def _init_conv_params(key, cin, cout, ksize, *, cin_pad, cout_pad):
    """PyTorch-style uniform init, stored as (K, Cin_pad, Cout_pad) / (1, Cout_pad).

    NOTE: torch stores Conv1d weights as (Cout, Cin, K); a real checkpoint would
    need transpose(2, 1, 0) plus zero lane-padding to load here (init below is
    only distribution-equivalent)."""
    kw, kb = jax.random.split(key)
    bound = 1.0 / math.sqrt(cin * ksize)
    w = jax.random.uniform(kw, (ksize, cin, cout), jnp.float32, -bound, bound)
    b = jax.random.uniform(kb, (cout,), jnp.float32, -bound, bound)
    w = jnp.pad(w, ((0, 0), (0, cin_pad - cin), (0, cout_pad - cout)))
    b = jnp.pad(b, ((0, cout_pad - cout),)).reshape(1, cout_pad)
    return w, b


def make_autoencoder_params(in_dim, out_dim, key):
    ks = jax.random.split(key, 4)
    return {
        "conv1": _init_conv_params(ks[0], in_dim, 128, 7, cin_pad=LANE, cout_pad=128),
        "conv2": _init_conv_params(ks[1], 128, 256, 5, cin_pad=128, cout_pad=256),
        "conv3": _init_conv_params(ks[2], 256, 128, 3, cin_pad=256, cout_pad=128),
        "conv4": _init_conv_params(ks[3], 128, out_dim, 3, cin_pad=128, cout_pad=LANE),
    }


def reference_forward(params, vi, imu_w, imu_a, *, in_dim, out_dim):
    """Pure JAX/XLA reference (lax conv, replicate padding) for correctness."""
    def conv(x, w, b, cin, cout, pad, relu):
        w = w[:, :cin, :cout]          # strip lane padding
        b = b[0, :cout]
        xp = jnp.pad(x, ((0, 0), (pad, pad), (0, 0)), mode="edge")
        y = jax.lax.conv_general_dilated(
            xp, w, window_strides=(1,), padding="VALID",
            dimension_numbers=("NWC", "WIO", "NWC"),
            precision=jax.lax.Precision.HIGHEST) + b
        return jnp.maximum(y, 0.0) if relu else y

    x = jnp.concatenate((vi, imu_w, imu_a), axis=-1)
    x = conv(x, *params["conv1"], in_dim, 128, 3, True)
    x = conv(x, *params["conv2"], 128, 256, 2, True)
    x = conv(x, *params["conv3"], 256, 128, 1, True)
    return conv(x, *params["conv4"], 128, out_dim, 1, False)


if __name__ == "__main__":
    key = jax.random.PRNGKey(0)
    k_vi, k_w, k_a, k_p = jax.random.split(key, 4)

    B, T = 2, 16
    vi_dim, w_dim, a_dim = 4, 3, 3            # in_dim = 10
    in_dim = vi_dim + w_dim + a_dim
    out_dim = 6
    # NOTE: z_dim from the torch __init__ is unused in its forward pass.

    vi = jax.random.normal(k_vi, (B, T, vi_dim), jnp.float32)
    imu_w = jax.random.normal(k_w, (B, T, w_dim), jnp.float32)
    imu_a = jax.random.normal(k_a, (B, T, a_dim), jnp.float32)

    params = make_autoencoder_params(in_dim, out_dim, k_p)

    out = autoencoder_forward(params, vi, imu_w, imu_a, out_dim=out_dim)
    jax.block_until_ready(out)
    assert out.shape == (B, T, out_dim), out.shape

    ref = reference_forward(params, vi, imu_w, imu_a, in_dim=in_dim, out_dim=out_dim)
    np.testing.assert_allclose(np.asarray(out), np.asarray(ref), rtol=2e-2, atol=1e-2)

    print("KERNEL_OK")
</pallas_src>

<mosaic_0001>
module attributes {stable_mosaic.version = 11 : i64} {
  func.func @_fused_autoencoder_kernel(%arg0: i32, %arg1: memref<1x16x128xf32, #tpu.memory_space<vmem>>, %arg2: memref<7x128x128xf32, #tpu.memory_space<vmem>>, %arg3: memref<1x128xf32, #tpu.memory_space<vmem>>, %arg4: memref<5x128x256xf32, #tpu.memory_space<vmem>>, %arg5: memref<1x256xf32, #tpu.memory_space<vmem>>, %arg6: memref<3x256x128xf32, #tpu.memory_space<vmem>>, %arg7: memref<1x128xf32, #tpu.memory_space<vmem>>, %arg8: memref<3x128x128xf32, #tpu.memory_space<vmem>>, %arg9: memref<1x128xf32, #tpu.memory_space<vmem>>, %arg10: memref<1x16x128xf32, #tpu.memory_space<vmem>>, %arg11: memref<32x128xf32, #tpu.memory_space<vmem>>, %arg12: memref<32x128xf32, #tpu.memory_space<vmem>>, %arg13: memref<32x256xf32, #tpu.memory_space<vmem>>, %arg14: memref<32x128xf32, #tpu.memory_space<vmem>>) attributes {dimension_semantics = [#tpu.dimension_semantics<parallel>], iteration_bounds = array<i64: 2>, scalar_prefetch = 0 : i64, scratch_operands = 4 : i64, tpu.core_type = #tpu.core_type<tc>, window_params = [{transform_indices = @transform_0, window_bounds = array<i64: 1, 16, 128>}, {pipeline_mode = #tpu.pipeline_mode<synchronous>, transform_indices = @transform_1, window_bounds = array<i64: 7, 128, 128>}, {pipeline_mode = #tpu.pipeline_mode<synchronous>, transform_indices = @transform_2, window_bounds = array<i64: 1, 128>}, {pipeline_mode = #tpu.pipeline_mode<synchronous>, transform_indices = @transform_3, window_bounds = array<i64: 5, 128, 256>}, {pipeline_mode = #tpu.pipeline_mode<synchronous>, transform_indices = @transform_4, window_bounds = array<i64: 1, 256>}, {pipeline_mode = #tpu.pipeline_mode<synchronous>, transform_indices = @transform_5, window_bounds = array<i64: 3, 256, 128>}, {pipeline_mode = #tpu.pipeline_mode<synchronous>, transform_indices = @transform_6, window_bounds = array<i64: 1, 128>}, {pipeline_mode = #tpu.pipeline_mode<synchronous>, transform_indices = @transform_7, window_bounds = array<i64: 3, 128, 128>}, {pipeline_mode = #tpu.pipeline_mode<synchronous>, transform_indices = @transform_8, window_bounds = array<i64: 1, 128>}, {transform_indices = @transform_9, window_bounds = array<i64: 1, 16, 128>}]} {
    %c0 = arith.constant 0 : index
    %c0_0 = arith.constant 0 : index
    %c0_1 = arith.constant 0 : index
    %0 = vector.load %arg1[%c0, %c0_0, %c0_1] : memref<1x16x128xf32, #tpu.memory_space<vmem>>, vector<1x16x128xf32>
    %1 = vector.shape_cast %0 : vector<1x16x128xf32> to vector<16x128xf32>
    %2 = vector.extract_strided_slice %1 {offsets = [0, 0], sizes = [1, 128], strides = [1, 1]} : vector<16x128xf32> to vector<1x128xf32>
    %3 = vector.shape_cast %2 : vector<1x128xf32> to vector<1x128xf32>
    %4 = vector.broadcast %3 : vector<1x128xf32> to vector<8x128xf32>
    %c0_2 = arith.constant 0 : index
    %c0_3 = arith.constant 0 : index
    %5 = vector.load %arg11[%c0_2, %c0_3] : memref<32x128xf32, #tpu.memory_space<vmem>>, vector<8x128xf32>
    tpu.vector_store %arg11[%c0_2, %c0_3], %4 {strides = array<i32>} : memref<32x128xf32, #tpu.memory_space<vmem>>, vector<8x128xf32>,
    %c8 = arith.constant 8 : index
    %c0_4 = arith.constant 0 : index
    %6 = vector.load %arg11[%c8, %c0_4] : memref<32x128xf32, #tpu.memory_space<vmem>>, vector<16x128xf32>
    tpu.vector_store %arg11[%c8, %c0_4], %1 {strides = array<i32>} : memref<32x128xf32, #tpu.memory_space<vmem>>, vector<16x128xf32>,
    %7 = vector.extract_strided_slice %1 {offsets = [15, 0], sizes = [1, 128], strides = [1, 1]} : vector<16x128xf32> to vector<1x128xf32>
    %8 = vector.shape_cast %7 : vector<1x128xf32> to vector<1x128xf32>
    %9 = vector.broadcast %8 : vector<1x128xf32> to vector<8x128xf32>
    %c24 = arith.constant 24 : index
    %c0_5 = arith.constant 0 : index
    %10 = vector.load %arg11[%c24, %c0_5] : memref<32x128xf32, #tpu.memory_space<vmem>>, vector<8x128xf32>
    tpu.vector_store %arg11[%c24, %c0_5], %9 {strides = array<i32>} : memref<32x128xf32, #tpu.memory_space<vmem>>, vector<8x128xf32>,
    %c0_6 = arith.constant 0 : index
    %c0_7 = arith.constant 0 : index
    %11 = vector.load %arg11[%c0_6, %c0_7] : memref<32x128xf32, #tpu.memory_space<vmem>>, vector<32x128xf32>
    %cst = arith.constant 0.000000e+00 : f32
    %12 = vector.broadcast %cst : f32 to vector<16x128xf32>
    %13 = vector.extract_strided_slice %11 {offsets = [5, 0], sizes = [16, 128], strides = [1, 1]} : vector<32x128xf32> to vector<16x128xf32>
    %c0_8 = arith.constant 0 : index
    %c0_9 = arith.constant 0 : index
    %c0_10 = arith.constant 0 : index
    %14 = vector.load %arg2[%c0_8, %c0_9, %c0_10] : memref<7x128x128xf32, #tpu.memory_space<vmem>>, vector<1x128x128xf32>
    %15 = vector.shape_cast %14 : vector<1x128x128xf32> to vector<128x128xf32>
    %cst_11 = arith.constant dense<0.000000e+00> : vector<16x128xf32>
    %16 = tpu.matmul %13, %15, %cst_11 {dimension_numbers = #tpu.dot_dimension_numbers<[1], [0], [0], [1], [0, 0, 1, 1], [], []>} : vector<16x128xf32>, vector<128x128xf32>, vector<16x128xf32> -> vector<16x128xf32>
    %17 = arith.addf %12, %16 : vector<16x128xf32>
    %18 = vector.extract_strided_slice %11 {offsets = [6, 0], sizes = [16, 128], strides = [1, 1]} : vector<32x128xf32> to vector<16x128xf32>
    %c1 = arith.constant 1 : index
    %c0_12 = arith.constant 0 : index
    %c0_13 = arith.constant 0 : index
    %19 = vector.load %arg2[%c1, %c0_12, %c0_13] : memref<7x128x128xf32, #tpu.memory_space<vmem>>, vector<1x128x128xf32>
    %20 = vector.shape_cast %19 : vector<1x128x128xf32> to vector<128x128xf32>
    %cst_14 = arith.constant dense<0.000000e+00> : vector<16x128xf32>
    %21 = tpu.matmul %18, %20, %cst_14 {dimension_numbers = #tpu.dot_dimension_numbers<[1], [0], [0], [1], [0, 0, 1, 1], [], []>} : vector<16x128xf32>, vector<128x128xf32>, vector<16x128xf32> -> vector<16x128xf32>
    %22 = arith.addf %17, %21 : vector<16x128xf32>
    %23 = vector.extract_strided_slice %11 {offsets = [7, 0], sizes = [16, 128], strides = [1, 1]} : vector<32x128xf32> to vector<16x128xf32>
    %c2 = arith.constant 2 : index
    %c0_15 = arith.constant 0 : index
    %c0_16 = arith.constant 0 : index
    %24 = vector.load %arg2[%c2, %c0_15, %c0_16] : memref<7x128x128xf32, #tpu.memory_space<vmem>>, vector<1x128x128xf32>
    %25 = vector.shape_cast %24 : vector<1x128x128xf32> to vector<128x128xf32>
    %cst_17 = arith.constant dense<0.000000e+00> : vector<16x128xf32>
    %26 = tpu.matmul %23, %25, %cst_17 {dimension_numbers = #tpu.dot_dimension_numbers<[1], [0], [0], [1], [0, 0, 1, 1], [], []>} : vector<16x128xf32>, vector<128x128xf32>, vector<16x128xf32> -> vector<16x128xf32>
    %27 = arith.addf %22, %26 : vector<16x128xf32>
    %28 = vector.extract_strided_slice %11 {offsets = [8, 0], sizes = [16, 128], strides = [1, 1]} : vector<32x128xf32> to vector<16x128xf32>
    %c3 = arith.constant 3 : index
    %c0_18 = arith.constant 0 : index
    %c0_19 = arith.constant 0 : index
    %29 = vector.load %arg2[%c3, %c0_18, %c0_19] : memref<7x128x128xf32, #tpu.memory_space<vmem>>, vector<1x128x128xf32>
    %30 = vector.shape_cast %29 : vector<1x128x128xf32> to vector<128x128xf32>
    %cst_20 = arith.constant dense<0.000000e+00> : vector<16x128xf32>
    %31 = tpu.matmul %28, %30, %cst_20 {dimension_numbers = #tpu.dot_dimension_numbers<[1], [0], [0], [1], [0, 0, 1, 1], [], []>} : vector<16x128xf32>, vector<128x128xf32>, vector<16x128xf32> -> vector<16x128xf32>
    %32 = arith.addf %27, %31 : vector<16x128xf32>
    %33 = vector.extract_strided_slice %11 {offsets = [9, 0], sizes = [16, 128], strides = [1, 1]} : vector<32x128xf32> to vector<16x128xf32>
    %c4 = arith.constant 4 : index
    %c0_21 = arith.constant 0 : index
    %c0_22 = arith.constant 0 : index
    %34 = vector.load %arg2[%c4, %c0_21, %c0_22] : memref<7x128x128xf32, #tpu.memory_space<vmem>>, vector<1x128x128xf32>
    %35 = vector.shape_cast %34 : vector<1x128x128xf32> to vector<128x128xf32>
    %cst_23 = arith.constant dense<0.000000e+00> : vector<16x128xf32>
    %36 = tpu.matmul %33, %35, %cst_23 {dimension_numbers = #tpu.dot_dimension_numbers<[1], [0], [0], [1], [0, 0, 1, 1], [], []>} : vector<16x128xf32>, vector<128x128xf32>, vector<16x128xf32> -> vector<16x128xf32>
    %37 = arith.addf %32, %36 : vector<16x128xf32>
    %38 = vector.extract_strided_slice %11 {offsets = [10, 0], sizes = [16, 128], strides = [1, 1]} : vector<32x128xf32> to vector<16x128xf32>
    %c5 = arith.constant 5 : index
    %c0_24 = arith.constant 0 : index
    %c0_25 = arith.constant 0 : index
    %39 = vector.load %arg2[%c5, %c0_24, %c0_25] : memref<7x128x128xf32, #tpu.memory_space<vmem>>, vector<1x128x128xf32>
    %40 = vector.shape_cast %39 : vector<1x128x128xf32> to vector<128x128xf32>
    %cst_26 = arith.constant dense<0.000000e+00> : vector<16x128xf32>
    %41 = tpu.matmul %38, %40, %cst_26 {dimension_numbers = #tpu.dot_dimension_numbers<[1], [0], [0], [1], [0, 0, 1, 1], [], []>} : vector<16x128xf32>, vector<128x128xf32>, vector<16x128xf32> -> vector<16x128xf32>
    %42 = arith.addf %37, %41 : vector<16x128xf32>
    %43 = vector.extract_strided_slice %11 {offsets = [11, 0], sizes = [16, 128], strides = [1, 1]} : vector<32x128xf32> to vector<16x128xf32>
    %c6 = arith.constant 6 : index
    %c0_27 = arith.constant 0 : index
    %c0_28 = arith.constant 0 : index
    %44 = vector.load %arg2[%c6, %c0_27, %c0_28] : memref<7x128x128xf32, #tpu.memory_space<vmem>>, vector<1x128x128xf32>
    %45 = vector.shape_cast %44 : vector<1x128x128xf32> to vector<128x128xf32>
    %cst_29 = arith.constant dense<0.000000e+00> : vector<16x128xf32>
    %46 = tpu.matmul %43, %45, %cst_29 {dimension_numbers = #tpu.dot_dimension_numbers<[1], [0], [0], [1], [0, 0, 1, 1], [], []>} : vector<16x128xf32>, vector<128x128xf32>, vector<16x128xf32> -> vector<16x128xf32>
    %47 = arith.addf %42, %46 : vector<16x128xf32>
    %c0_30 = arith.constant 0 : index
    %c0_31 = arith.constant 0 : index
    %48 = vector.load %arg3[%c0_30, %c0_31] : memref<1x128xf32, #tpu.memory_space<vmem>>, vector<1x128xf32>
    %49 = vector.broadcast %48 : vector<1x128xf32> to vector<16x128xf32>
    %50 = arith.addf %47, %49 : vector<16x128xf32>
    %cst_32 = arith.constant 0.000000e+00 : f32
    %51 = vector.broadcast %cst_32 : f32 to vector<16x128xf32>
    %52 = arith.maximumf %50, %51 : vector<16x128xf32>
    %53 = vector.extract_strided_slice %52 {offsets = [0, 0], sizes = [1, 128], strides = [1, 1]} : vector<16x128xf32> to vector<1x128xf32>
    %54 = vector.shape_cast %53 : vector<1x128xf32> to vector<1x128xf32>
    %55 = vector.broadcast %54 : vector<1x128xf32> to vector<8x128xf32>
    %c0_33 = arith.constant 0 : index
    %c0_34 = arith.constant 0 : index
    %56 = vector.load %arg12[%c0_33, %c0_34] : memref<32x128xf32, #tpu.memory_space<vmem>>, vector<8x128xf32>
    tpu.vector_store %arg12[%c0_33, %c0_34], %55 {strides = array<i32>} : memref<32x128xf32, #tpu.memory_space<vmem>>, vector<8x128xf32>,
    %c8_35 = arith.constant 8 : index
    %c0_36 = arith.constant 0 : index
    %57 = vector.load %arg12[%c8_35, %c0_36] : memref<32x128xf32, #tpu.memory_space<vmem>>, vector<16x128xf32>
    tpu.vector_store %arg12[%c8_35, %c0_36], %52 {strides = array<i32>} : memref<32x128xf32, #tpu.memory_space<vmem>>, vector<16x128xf32>,
    %58 = vector.extract_strided_slice %52 {offsets = [15, 0], sizes = [1, 128], strides = [1, 1]} : vector<16x128xf32> to vector<1x128xf32>
    %59 = vector.shape_cast %58 : vector<1x128xf32> to vector<1x128xf32>
    %60 = vector.broadcast %59 : vector<1x128xf32> to vector<8x128xf32>
    %c24_37 = arith.constant 24 : index
    %c0_38 = arith.constant 0 : index
    %61 = vector.load %arg12[%c24_37, %c0_38] : memref<32x128xf32, #tpu.memory_space<vmem>>, vector<8x128xf32>
    tpu.vector_store %arg12[%c24_37, %c0_38], %60 {strides = array<i32>} : memref<32x128xf32, #tpu.memory_space<vmem>>, vector<8x128xf32>,
    %c0_39 = arith.constant 0 : index
    %c0_40 = arith.constant 0 : index
    %62 = vector.load %arg12[%c0_39, %c0_40] : memref<32x128xf32, #tpu.memory_space<vmem>>, vector<32x128xf32>
    %cst_41 = arith.constant 0.000000e+00 : f32
    %63 = vector.broadcast %cst_41 : f32 to vector<16x256xf32>
    %64 = vector.extract_strided_slice %62 {offsets = [6, 0], sizes = [16, 128], strides = [1, 1]} : vector<32x128xf32> to vector<16x128xf32>
    %c0_42 = arith.constant 0 : index
    %c0_43 = arith.constant 0 : index
    %c0_44 = arith.constant 0 : index
    %65 = vector.load %arg4[%c0_42, %c0_43, %c0_44] : memref<5x128x256xf32, #tpu.memory_space<vmem>>, vector<1x128x256xf32>
    %66 = vector.shape_cast %65 : vector<1x128x256xf32> to vector<128x256xf32>
    %cst_45 = arith.constant dense<0.000000e+00> : vector<16x256xf32>
    %67 = tpu.matmul %64, %66, %cst_45 {dimension_numbers = #tpu.dot_dimension_numbers<[1], [0], [0], [1], [0, 0, 1, 1], [], []>} : vector<16x128xf32>, vector<128x256xf32>, vector<16x256xf32> -> vector<16x256xf32>
    %68 = arith.addf %63, %67 : vector<16x256xf32>
    %69 = vector.extract_strided_slice %62 {offsets = [7, 0], sizes = [16, 128], strides = [1, 1]} : vector<32x128xf32> to vector<16x128xf32>
    %c1_46 = arith.constant 1 : index
    %c0_47 = arith.constant 0 : index
    %c0_48 = arith.constant 0 : index
    %70 = vector.load %arg4[%c1_46, %c0_47, %c0_48] : memref<5x128x256xf32, #tpu.memory_space<vmem>>, vector<1x128x256xf32>
    %71 = vector.shape_cast %70 : vector<1x128x256xf32> to vector<128x256xf32>
    %cst_49 = arith.constant dense<0.000000e+00> : vector<16x256xf32>
    %72 = tpu.matmul %69, %71, %cst_49 {dimension_numbers = #tpu.dot_dimension_numbers<[1], [0], [0], [1], [0, 0, 1, 1], [], []>} : vector<16x128xf32>, vector<128x256xf32>, vector<16x256xf32> -> vector<16x256xf32>
    %73 = arith.addf %68, %72 : vector<16x256xf32>
    %74 = vector.extract_strided_slice %62 {offsets = [8, 0], sizes = [16, 128], strides = [1, 1]} : vector<32x128xf32> to vector<16x128xf32>
    %c2_50 = arith.constant 2 : index
    %c0_51 = arith.constant 0 : index
    %c0_52 = arith.constant 0 : index
    %75 = vector.load %arg4[%c2_50, %c0_51, %c0_52] : memref<5x128x256xf32, #tpu.memory_space<vmem>>, vector<1x128x256xf32>
    %76 = vector.shape_cast %75 : vector<1x128x256xf32> to vector<128x256xf32>
    %cst_53 = arith.constant dense<0.000000e+00> : vector<16x256xf32>
    %77 = tpu.matmul %74, %76, %cst_53 {dimension_numbers = #tpu.dot_dimension_numbers<[1], [0], [0], [1], [0, 0, 1, 1], [], []>} : vector<16x128xf32>, vector<128x256xf32>, vector<16x256xf32> -> vector<16x256xf32>
    %78 = arith.addf %73, %77 : vector<16x256xf32>
    %79 = vector.extract_strided_slice %62 {offsets = [9, 0], sizes = [16, 128], strides = [1, 1]} : vector<32x128xf32> to vector<16x128xf32>
    %c3_54 = arith.constant 3 : index
    %c0_55 = arith.constant 0 : index
    %c0_56 = arith.constant 0 : index
    %80 = vector.load %arg4[%c3_54, %c0_55, %c0_56] : memref<5x128x256xf32, #tpu.memory_space<vmem>>, vector<1x128x256xf32>
    %81 = vector.shape_cast %80 : vector<1x128x256xf32> to vector<128x256xf32>
    %cst_57 = arith.constant dense<0.000000e+00> : vector<16x256xf32>
    %82 = tpu.matmul %79, %81, %cst_57 {dimension_numbers = #tpu.dot_dimension_numbers<[1], [0], [0], [1], [0, 0, 1, 1], [], []>} : vector<16x128xf32>, vector<128x256xf32>, vector<16x256xf32> -> vector<16x256xf32>
    %83 = arith.addf %78, %82 : vector<16x256xf32>
    %84 = vector.extract_strided_slice %62 {offsets = [10, 0], sizes = [16, 128], strides = [1, 1]} : vector<32x128xf32> to vector<16x128xf32>
    %c4_58 = arith.constant 4 : index
    %c0_59 = arith.constant 0 : index
    %c0_60 = arith.constant 0 : index
    %85 = vector.load %arg4[%c4_58, %c0_59, %c0_60] : memref<5x128x256xf32, #tpu.memory_space<vmem>>, vector<1x128x256xf32>
    %86 = vector.shape_cast %85 : vector<1x128x256xf32> to vector<128x256xf32>
    %cst_61 = arith.constant dense<0.000000e+00> : vector<16x256xf32>
    %87 = tpu.matmul %84, %86, %cst_61 {dimension_numbers = #tpu.dot_dimension_numbers<[1], [0], [0], [1], [0, 0, 1, 1], [], []>} : vector<16x128xf32>, vector<128x256xf32>, vector<16x256xf32> -> vector<16x256xf32>
    %88 = arith.addf %83, %87 : vector<16x256xf32>
    %c0_62 = arith.constant 0 : index
    %c0_63 = arith.constant 0 : index
    %89 = vector.load %arg5[%c0_62, %c0_63] : memref<1x256xf32, #tpu.memory_space<vmem>>, vector<1x256xf32>
    %90 = vector.broadcast %89 : vector<1x256xf32> to vector<16x256xf32>
    %91 = arith.addf %88, %90 : vector<16x256xf32>
    %cst_64 = arith.constant 0.000000e+00 : f32
    %92 = vector.broadcast %cst_64 : f32 to vector<16x256xf32>
    %93 = arith.maximumf %91, %92 : vector<16x256xf32>
    %94 = vector.extract_strided_slice %93 {offsets = [0, 0], sizes = [1, 256], strides = [1, 1]} : vector<16x256xf32> to vector<1x256xf32>
    %95 = vector.shape_cast %94 : vector<1x256xf32> to vector<1x256xf32>
    %96 = vector.broadcast %95 : vector<1x256xf32> to vector<8x256xf32>
    %c0_65 = arith.constant 0 : index
    %c0_66 = arith.constant 0 : index
    %97 = vector.load %arg13[%c0_65, %c0_66] : memref<32x256xf32, #tpu.memory_space<vmem>>, vector<8x256xf32>
    tpu.vector_store %arg13[%c0_65, %c0_66], %96 {strides = array<i32>} : memref<32x256xf32, #tpu.memory_space<vmem>>, vector<8x256xf32>,
    %c8_67 = arith.constant 8 : index
    %c0_68 = arith.constant 0 : index
    %98 = vector.load %arg13[%c8_67, %c0_68] : memref<32x256xf32, #tpu.memory_space<vmem>>, vector<16x256xf32>
    tpu.vector_store %arg13[%c8_67, %c0_68], %93 {strides = array<i32>} : memref<32x256xf32, #tpu.memory_space<vmem>>, vector<16x256xf32>,
    %99 = vector.extract_strided_slice %93 {offsets = [15, 0], sizes = [1, 256], strides = [1, 1]} : vector<16x256xf32> to vector<1x256xf32>
    %100 = vector.shape_cast %99 : vector<1x256xf32> to vector<1x256xf32>
    %101 = vector.broadcast %100 : vector<1x256xf32> to vector<8x256xf32>
    %c24_69 = arith.constant 24 : index
    %c0_70 = arith.constant 0 : index
    %102 = vector.load %arg13[%c24_69, %c0_70] : memref<32x256xf32, #tpu.memory_space<vmem>>, vector<8x256xf32>
    tpu.vector_store %arg13[%c24_69, %c0_70], %101 {strides = array<i32>} : memref<32x256xf32, #tpu.memory_space<vmem>>, vector<8x256xf32>,
    %c0_71 = arith.constant 0 : index
    %c0_72 = arith.constant 0 : index
    %103 = vector.load %arg13[%c0_71, %c0_72] : memref<32x256xf32, #tpu.memory_space<vmem>>, vector<32x256xf32>
    %cst_73 = arith.constant 0.000000e+00 : f32
    %104 = vector.broadcast %cst_73 : f32 to vector<16x128xf32>
    %105 = vector.extract_strided_slice %103 {offsets = [7, 0], sizes = [16, 256], strides = [1, 1]} : vector<32x256xf32> to vector<16x256xf32>
    %c0_74 = arith.constant 0 : index
    %c0_75 = arith.constant 0 : index
    %c0_76 = arith.constant 0 : index
    %106 = vector.load %arg6[%c0_74, %c0_75, %c0_76] : memref<3x256x128xf32, #tpu.memory_space<vmem>>, vector<1x256x128xf32>
    %107 = vector.shape_cast %106 : vector<1x256x128xf32> to vector<256x128xf32>
    %cst_77 = arith.constant dense<0.000000e+00> : vector<16x128xf32>
    %108 = tpu.matmul %105, %107, %cst_77 {dimension_numbers = #tpu.dot_dimension_numbers<[1], [0], [0], [1], [0, 0, 1, 1], [], []>} : vector<16x256xf32>, vector<256x128xf32>, vector<16x128xf32> -> vector<16x128xf32>
    %109 = arith.addf %104, %108 : vector<16x128xf32>
    %110 = vector.extract_strided_slice %103 {offsets = [8, 0], sizes = [16, 256], strides = [1, 1]} : vector<32x256xf32> to vector<16x256xf32>
    %c1_78 = arith.constant 1 : index
    %c0_79 = arith.constant 0 : index
    %c0_80 = arith.constant 0 : index
    %111 = vector.load %arg6[%c1_78, %c0_79, %c0_80] : memref<3x256x128xf32, #tpu.memory_space<vmem>>, vector<1x256x128xf32>
    %112 = vector.shape_cast %111 : vector<1x256x128xf32> to vector<256x128xf32>
    %cst_81 = arith.constant dense<0.000000e+00> : vector<16x128xf32>
    %113 = tpu.matmul %110, %112, %cst_81 {dimension_numbers = #tpu.dot_dimension_numbers<[1], [0], [0], [1], [0, 0, 1, 1], [], []>} : vector<16x256xf32>, vector<256x128xf32>, vector<16x128xf32> -> vector<16x128xf32>
    %114 = arith.addf %109, %113 : vector<16x128xf32>
    %115 = vector.extract_strided_slice %103 {offsets = [9, 0], sizes = [16, 256], strides = [1, 1]} : vector<32x256xf32> to vector<16x256xf32>
    %c2_82 = arith.constant 2 : index
    %c0_83 = arith.constant 0 : index
    %c0_84 = arith.constant 0 : index
    %116 = vector.load %arg6[%c2_82, %c0_83, %c0_84] : memref<3x256x128xf32, #tpu.memory_space<vmem>>, vector<1x256x128xf32>
    %117 = vector.shape_cast %116 : vector<1x256x128xf32> to vector<256x128xf32>
    %cst_85 = arith.constant dense<0.000000e+00> : vector<16x128xf32>
    %118 = tpu.matmul %115, %117, %cst_85 {dimension_numbers = #tpu.dot_dimension_numbers<[1], [0], [0], [1], [0, 0, 1, 1], [], []>} : vector<16x256xf32>, vector<256x128xf32>, vector<16x128xf32> -> vector<16x128xf32>
    %119 = arith.addf %114, %118 : vector<16x128xf32>
    %c0_86 = arith.constant 0 : index
    %c0_87 = arith.constant 0 : index
    %120 = vector.load %arg7[%c0_86, %c0_87] : memref<1x128xf32, #tpu.memory_space<vmem>>, vector<1x128xf32>
    %121 = vector.broadcast %120 : vector<1x128xf32> to vector<16x128xf32>
    %122 = arith.addf %119, %121 : vector<16x128xf32>
    %cst_88 = arith.constant 0.000000e+00 : f32
    %123 = vector.broadcast %cst_88 : f32 to vector<16x128xf32>
    %124 = arith.maximumf %122, %123 : vector<16x128xf32>
    %125 = vector.extract_strided_slice %124 {offsets = [0, 0], sizes = [1, 128], strides = [1, 1]} : vector<16x128xf32> to vector<1x128xf32>
    %126 = vector.shape_cast %125 : vector<1x128xf32> to vector<1x128xf32>
    %127 = vector.broadcast %126 : vector<1x128xf32> to vector<8x128xf32>
    %c0_89 = arith.constant 0 : index
    %c0_90 = arith.constant 0 : index
    %128 = vector.load %arg14[%c0_89, %c0_90] : memref<32x128xf32, #tpu.memory_space<vmem>>, vector<8x128xf32>
    tpu.vector_store %arg14[%c0_89, %c0_90], %127 {strides = array<i32>} : memref<32x128xf32, #tpu.memory_space<vmem>>, vector<8x128xf32>,
    %c8_91 = arith.constant 8 : index
    %c0_92 = arith.constant 0 : index
    %129 = vector.load %arg14[%c8_91, %c0_92] : memref<32x128xf32, #tpu.memory_space<vmem>>, vector<16x128xf32>
    tpu.vector_store %arg14[%c8_91, %c0_92], %124 {strides = array<i32>} : memref<32x128xf32, #tpu.memory_space<vmem>>, vector<16x128xf32>,
    %130 = vector.extract_strided_slice %124 {offsets = [15, 0], sizes = [1, 128], strides = [1, 1]} : vector<16x128xf32> to vector<1x128xf32>
    %131 = vector.shape_cast %130 : vector<1x128xf32> to vector<1x128xf32>
    %132 = vector.broadcast %131 : vector<1x128xf32> to vector<8x128xf32>
    %c24_93 = arith.constant 24 : index
    %c0_94 = arith.constant 0 : index
    %133 = vector.load %arg14[%c24_93, %c0_94] : memref<32x128xf32, #tpu.memory_space<vmem>>, vector<8x128xf32>
    tpu.vector_store %arg14[%c24_93, %c0_94], %132 {strides = array<i32>} : memref<32x128xf32, #tpu.memory_space<vmem>>, vector<8x128xf32>,
    %c0_95 = arith.constant 0 : index
    %c0_96 = arith.constant 0 : index
    %134 = vector.load %arg14[%c0_95, %c0_96] : memref<32x128xf32, #tpu.memory_space<vmem>>, vector<32x128xf32>
    %cst_97 = arith.constant 0.000000e+00 : f32
    %135 = vector.broadcast %cst_97 : f32 to vector<16x128xf32>
    %136 = vector.extract_strided_slice %134 {offsets = [7, 0], sizes = [16, 128], strides = [1, 1]} : vector<32x128xf32> to vector<16x128xf32>
    %c0_98 = arith.constant 0 : index
    %c0_99 = arith.constant 0 : index
    %c0_100 = arith.constant 0 : index
    %137 = vector.load %arg8[%c0_98, %c0_99, %c0_100] : memref<3x128x128xf32, #tpu.memory_space<vmem>>, vector<1x128x128xf32>
    %138 = vector.shape_cast %137 : vector<1x128x128xf32> to vector<128x128xf32>
    %cst_101 = arith.constant dense<0.000000e+00> : vector<16x128xf32>
    %139 = tpu.matmul %136, %138, %cst_101 {dimension_numbers = #tpu.dot_dimension_numbers<[1], [0], [0], [1], [0, 0, 1, 1], [], []>} : vector<16x128xf32>, vector<128x128xf32>, vector<16x128xf32> -> vector<16x128xf32>
    %140 = arith.addf %135, %139 : vector<16x128xf32>
    %141 = vector.extract_strided_slice %134 {offsets = [8, 0], sizes = [16, 128], strides = [1, 1]} : vector<32x128xf32> to vector<16x128xf32>
    %c1_102 = arith.constant 1 : index
    %c0_103 = arith.constant 0 : index
    %c0_104 = arith.constant 0 : index
    %142 = vector.load %arg8[%c1_102, %c0_103, %c0_104] : memref<3x128x128xf32, #tpu.memory_space<vmem>>, vector<1x128x128xf32>
    %143 = vector.shape_cast %142 : vector<1x128x128xf32> to vector<128x128xf32>
    %cst_105 = arith.constant dense<0.000000e+00> : vector<16x128xf32>
    %144 = tpu.matmul %141, %143, %cst_105 {dimension_numbers = #tpu.dot_dimension_numbers<[1], [0], [0], [1], [0, 0, 1, 1], [], []>} : vector<16x128xf32>, vector<128x128xf32>, vector<16x128xf32> -> vector<16x128xf32>
    %145 = arith.addf %140, %144 : vector<16x128xf32>
    %146 = vector.extract_strided_slice %134 {offsets = [9, 0], sizes = [16, 128], strides = [1, 1]} : vector<32x128xf32> to vector<16x128xf32>
    %c2_106 = arith.constant 2 : index
    %c0_107 = arith.constant 0 : index
    %c0_108 = arith.constant 0 : index
    %147 = vector.load %arg8[%c2_106, %c0_107, %c0_108] : memref<3x128x128xf32, #tpu.memory_space<vmem>>, vector<1x128x128xf32>
    %148 = vector.shape_cast %147 : vector<1x128x128xf32> to vector<128x128xf32>
    %cst_109 = arith.constant dense<0.000000e+00> : vector<16x128xf32>
    %149 = tpu.matmul %146, %148, %cst_109 {dimension_numbers = #tpu.dot_dimension_numbers<[1], [0], [0], [1], [0, 0, 1, 1], [], []>} : vector<16x128xf32>, vector<128x128xf32>, vector<16x128xf32> -> vector<16x128xf32>
    %150 = arith.addf %145, %149 : vector<16x128xf32>
    %c0_110 = arith.constant 0 : index
    %c0_111 = arith.constant 0 : index
    %151 = vector.load %arg9[%c0_110, %c0_111] : memref<1x128xf32, #tpu.memory_space<vmem>>, vector<1x128xf32>
    %152 = vector.broadcast %151 : vector<1x128xf32> to vector<16x128xf32>
    %153 = arith.addf %150, %152 : vector<16x128xf32>
    %c0_112 = arith.constant 0 : index
    %c0_113 = arith.constant 0 : index
    %c0_114 = arith.constant 0 : index
    %154 = vector.load %arg10[%c0_112, %c0_113, %c0_114] : memref<1x16x128xf32, #tpu.memory_space<vmem>>, vector<1x16x128xf32>
    %155 = vector.shape_cast %154 : vector<1x16x128xf32> to vector<16x128xf32>
    %156 = vector.shape_cast %153 : vector<16x128xf32> to vector<1x16x128xf32>
    tpu.vector_store %arg10[%c0_112, %c0_113, %c0_114], %156 {strides = array<i32>} : memref<1x16x128xf32, #tpu.memory_space<vmem>>, vector<1x16x128xf32>,
    return
  }
  func.func @transform_0(%arg0: i32) -> (i32, i32, i32) {
    %c0_i32 = arith.constant 0 : i32
    %c0_i32_0 = arith.constant 0 : i32
    %c0_i32_1 = arith.constant 0 : i32
    return %arg0, %c0_i32, %c0_i32_0 : i32, i32, i32
  }
  func.func @transform_1(%arg0: i32) -> (i32, i32, i32) {
    %c0_i32 = arith.constant 0 : i32
    %c0_i32_0 = arith.constant 0 : i32
    %c0_i32_1 = arith.constant 0 : i32
    %c0_i32_2 = arith.constant 0 : i32
    return %c0_i32, %c0_i32_0, %c0_i32_1 : i32, i32, i32
  }
  func.func @transform_2(%arg0: i32) -> (i32, i32) {
    %c0_i32 = arith.constant 0 : i32
    %c0_i32_0 = arith.constant 0 : i32
    %c0_i32_1 = arith.constant 0 : i32
    return %c0_i32, %c0_i32_0 : i32, i32
  }
  func.func @transform_3(%arg0: i32) -> (i32, i32, i32) {
    %c0_i32 = arith.constant 0 : i32
    %c0_i32_0 = arith.constant 0 : i32
    %c0_i32_1 = arith.constant 0 : i32
    %c0_i32_2 = arith.constant 0 : i32
    return %c0_i32, %c0_i32_0, %c0_i32_1 : i32, i32, i32
  }
  func.func @transform_4(%arg0: i32) -> (i32, i32) {
    %c0_i32 = arith.constant 0 : i32
    %c0_i32_0 = arith.constant 0 : i32
    %c0_i32_1 = arith.constant 0 : i32
    return %c0_i32, %c0_i32_0 : i32, i32
  }
  func.func @transform_5(%arg0: i32) -> (i32, i32, i32) {
    %c0_i32 = arith.constant 0 : i32
    %c0_i32_0 = arith.constant 0 : i32
    %c0_i32_1 = arith.constant 0 : i32
    %c0_i32_2 = arith.constant 0 : i32
    return %c0_i32, %c0_i32_0, %c0_i32_1 : i32, i32, i32
  }
  func.func @transform_6(%arg0: i32) -> (i32, i32) {
    %c0_i32 = arith.constant 0 : i32
    %c0_i32_0 = arith.constant 0 : i32
    %c0_i32_1 = arith.constant 0 : i32
    return %c0_i32, %c0_i32_0 : i32, i32
  }
  func.func @transform_7(%arg0: i32) -> (i32, i32, i32) {
    %c0_i32 = arith.constant 0 : i32
    %c0_i32_0 = arith.constant 0 : i32
    %c0_i32_1 = arith.constant 0 : i32
    %c0_i32_2 = arith.constant 0 : i32
    return %c0_i32, %c0_i32_0, %c0_i32_1 : i32, i32, i32
  }
  func.func @transform_8(%arg0: i32) -> (i32, i32) {
    %c0_i32 = arith.constant 0 : i32
    %c0_i32_0 = arith.constant 0 : i32
    %c0_i32_1 = arith.constant 0 : i32
    return %c0_i32, %c0_i32_0 : i32, i32
  }
  func.func @transform_9(%arg0: i32) -> (i32, i32, i32) {
    %c0_i32 = arith.constant 0 : i32
    %c0_i32_0 = arith.constant 0 : i32
    %c0_i32_1 = arith.constant 0 : i32
    return %arg0, %c0_i32, %c0_i32_0 : i32, i32, i32
  }
}

</mosaic_0001>

<bundles_post_ra>
// kernel: autoencoder_forward.1
= control target key start
LH: loop header
LB: loop body
LE: loop exit
PB: predicated region body
PF: predicated region fallthrough
CT: control target
= control target key end

     0   :  { %14 = vsyncpa [#allocation7], 0  ;;  %s2271_s0 = inlined_call_operand.vmem [shape: f32[2,16,128], index: 0, kind: input, shape index: {}]   ;;  %s2272_s1 = inlined_call_operand.hbm [shape: f32[7,128,128], index: 1, kind: input, shape index: {}]   ;;  %s2273_s2 = inlined_call_operand.vmem [shape: f32[1,128], index: 2, kind: input, shape index: {}]   ;;  %s2274_s3 = inlined_call_operand.hbm [shape: f32[5,128,256], index: 3, kind: input, shape index: {}]   ;;  %s2275_s4 = inlined_call_operand.vmem [shape: f32[1,256], index: 4, kind: input, shape index: {}]   ;;  %s2276_s5 = inlined_call_operand.hbm [shape: f32[3,256,128], index: 5, kind: input, shape index: {}]   ;;  %s2277_s6 = inlined_call_operand.vmem [shape: f32[1,128], index: 6, kind: input, shape index: {}]   ;;  %s2278_s7 = inlined_call_operand.hbm [shape: f32[3,128,128], index: 7, kind: input, shape index: {}]   ;;  %s2279_s8 = inlined_call_operand.vmem [shape: f32[1,128], index: 8, kind: input, shape index: {}]   ;;  %s2280_s9 = inlined_call_operand.vmem [shape: f32[2,16,128], index: 9, kind: output, shape index: {}]  }
   0x1   :  { %15 = vsyncpa [#allocation9], 0 }
   0x2   :  { %16 = vsyncpa [#allocation12], 0  ;;  %s2085_s30 = smov 0  }
   0x3 LB: > { %s275_s12 = sshll.u32 %s2274_s3, 4  ;;  %s2094_s13 = sadd.s32 4294967295, %s2025_s30   ;;  %s2025_s30 = sphi %s2085_s30, %s22_s30   ;;  %s276_s12 = int_to_ptr.hbm [resolvable:$true] %s275_s12 }
   0x4   : > { %p1780_p0 = scmp.ge.s32.totalorder %s2025_s30, 1  ;;  %p247_p1 = scmp.lt.s32.totalorder %s2025_s30, 3 }
   0x5   : > { %p1860_p2 = scmp.eq.s32.totalorder %s2094_s13, 0  ;;  %s2027_s15 = smov [#allocation8]  }
   0x6   : > { %p2099_p3 = pnand %p1780_p0, %p247_p1  ;;  %s277_s16 = sshll.u32 %s2027_s15, 4  ;;  %s278_s16 = int_to_ptr.vmem [resolvable:$true] %s277_s16 }
   0x7   : > { %s258_s19 = sshll.u32 %s2272_s1, 4  ;;  %s2028_s21 = smov [#allocation6]   ;;  %s259_s19 = int_to_ptr.hbm [resolvable:$true] %s258_s19 }
   0x8   : > { %p1847_p4 = pneg %p2099_p3  ;;  %s260_s22 = sshll.u32 %s2028_s21, 4  ;;  %s261_s22 = int_to_ptr.vmem [resolvable:$true] %s260_s22 }
   0x9   : > { %s2029_s23 = smov 256   ;;  %s2030_s24 = smov 16  }
   0xa   : > { %p2110_p5 = pnand %p1860_p2, %p1847_p4  ;;  %s292_s27 = sshll.u32 %s2276_s5, 4  ;;  %s293_s27 = int_to_ptr.hbm [resolvable:$true] %s292_s27 }
   0xb   : > { %s2031_s28 = smov 128   ;;  %s2032_s29 = smov 8  }
   0xc   : > { %1853 = dma.hbm_to_vmem [thread:$0]  (!%p2110_p5), %s276_s12, 20480, %s278_s16, [#allocation9], %s2029_s23, %s2029_s23, %s2030_s24  }
   0xd   : > { %1850 = dma.hbm_to_vmem [thread:$0]  (!%p2110_p5), %s259_s19, 14336, %s261_s22, [#allocation7], %s2031_s28, %s2031_s28, %s2032_s29  }
   0xe   : > { %s2033_s10 = smov [#allocation10]   ;;  %s309_s18 = sshll.u32 %s2278_s7, 4  ;;  %s310_s18 = int_to_ptr.hbm [resolvable:$true] %s309_s18 }
   0xf   : > { %s294_s11 = sshll.u32 %s2033_s10, 4  ;;  %s2034_s12 = smov [#allocation11]   ;;  %s295_s11 = int_to_ptr.vmem [resolvable:$true] %s294_s11 }
  0x10   : > { %1856 = dma.hbm_to_vmem [thread:$0]  (!%p2110_p5), %s293_s27, 12288, %s295_s11, [#allocation9], %s2031_s28, %s2031_s28, %s2032_s29  }
  0x11   : > { %s311_s16 = sshll.u32 %s2034_s12, 4  ;;  %338 = sbr.rel (%p2099_p3) target bundleno = 713 (0x2c9), region = 56  ;;  %s312_s16 = int_to_ptr.vmem [resolvable:$true] %s311_s16 }
  0x12   : > { %1859 = dma.hbm_to_vmem [thread:$0]  (!%p2110_p5), %s310_s18, 6144, %s312_s16, [#allocation12], %s2031_s28, %s2031_s28, %s2032_s29  }
  0x16   : > { %2012 = dma.done.wait (%p1860_p2), [#allocation7], 14336  }
  0x17   : > { %2014 = vsyncadd (%p1860_p2), [#allocation7], 4294952960 }
  0x18   : > { %2016 = dma.done.wait (%p1860_p2), [#allocation9], 32768  }
  0x19   : > { %2018 = vsyncadd (%p1860_p2), [#allocation9], 4294934528 }
  0x1a   : > { %2020 = dma.done.wait (%p1860_p2), [#allocation12], 6144  }
  0x1b   : > { %2022 = vsyncadd (%p1860_p2), [#allocation12], 4294961152  ;;  %v444_v0 = vld [vmem:[#allocation6 + $0xf8] sm:$0xff]  ;;  %v443_v2 = vld [vmem:[#allocation6 + $0xf0] sm:$0xff]  ;;  %p390_p6 = scmp.lt.s32.totalorder %s2094_s13, 1  ;;  %vm448_vm0 = vcmask 1041408  }
  0x1c   : > { %v526_v1 = vld [vmem:[#allocation6 + $0x178] sm:$0xff]  ;;  %456 = vmatpush.msra.mxu0 %v444_v0  ;;  %v525_v4 = vld [vmem:[#allocation6 + $0x170] sm:$0xff]  ;;  %v442_v5 = vld [vmem:[#allocation6 + $0xe8] sm:$0xff]  ;;  %vm479_vm1 = vcmask 1042432   ;;  %vm527_vm2 = vcmask 1040384   ;;  %vm620_vm3 = vcmask 1046528  }
  0x1d   : > { %535 = vmatpush.msra.mxu2 %v526_v1  ;;  %v427_v3 = vld [vmem:[#allocation6 + $0x78] sm:$0xff]  ;;  %v426_v6 = vld [vmem:[#allocation6 + $0x70] sm:$0xff]  ;;  %v524_v7 = vld [vmem:[#allocation6 + $0x168] sm:$0xff]  ;;  %s2284_s13 = smov (!%p390_p6, %s2094_s13), 1  ;;  %vm720_vm4 = vcmask 1044480   ;;  %vm670_vm5 = vcmask 1045504  }
  0x1e   : > { %487 = vmatpush.msra.mxu1 %v427_v3  ;;  %457 = vmatpush.msra.mxu0 %v443_v2  ;;  %v425_v8 = vld [vmem:[#allocation6 + $0x68] sm:$0xff]  ;;  %v441_v9 = vld [vmem:[#allocation6 + $0xe0] sm:$0xff]  ;;  %v440_v12 = vld [vmem:[#allocation6 + $0xd8] sm:$0xff]  ;;  %s1797_s14 = sshll.u32 %s2284_s13, 4 }
  0x1f   : > { %536 = vmatpush.msra.mxu2 %v525_v4  ;;  %v523_v10 = vld [vmem:[#allocation6 + $0x160] sm:$0xff]  ;;  %v522_v13 = vld [vmem:[#allocation6 + $0x158] sm:$0xff]  ;;  %v439_v16 = vld [vmem:[#allocation6 + $0xd0] sm:$0xff]  ;;  %s2154_s21 = scalar_lea.vmem %s2271_s0, %s1797_s14  ;;  %s399_s15 = scalar_lea.vmem %s2280_s9, %s1797_s14 }
  0x20   : > { %488 = vmatpush.msra.mxu1 %v426_v6  ;;  %458 = vmatpush.msra.mxu0 %v442_v5  ;;  %v424_v11 = vld [vmem:[#allocation6 + $0x60] sm:$0xff]  ;;  %v423_v14 = vld [vmem:[#allocation6 + $0x58] sm:$0xff]  ;;  %v521_v17 = vld [vmem:[#allocation6 + $0x150] sm:$0xff] }
  0x21   : > { %537 = vmatpush.msra.mxu2 %v524_v7  ;;  %v576_v15 = vld [vmem:[#allocation6 + $0x1f8] sm:$0xff]  ;;  %v422_v18 = vld [vmem:[#allocation6 + $0x50] sm:$0xff]  ;;  %v438_v20 = vld [vmem:[#allocation6 + $0xc8] sm:$0xff] }
  0x22   : > { %489 = vmatpush.msra.mxu1 %v425_v8  ;;  %459 = vmatpush.msra.mxu0 %v441_v9  ;;  %v575_v19 = vld [vmem:[#allocation6 + $0x1f0] sm:$0xff]  ;;  %v520_v21 = vld [vmem:[#allocation6 + $0x148] sm:$0xff]  ;;  %v573_v24 = vld [vmem:[#allocation6 + $0x1e0] sm:$0xff] }
  0x23   : > { %538 = vmatpush.msra.mxu2 %v523_v10  ;;  %577 = vmatpush.msra.mxu3 %v576_v15  ;;  %v574_v22 = vld [vmem:[#allocation6 + $0x1e8] sm:$0xff]  ;;  %v437_v25 = vld [vmem:[#allocation6 + $0xc0] sm:$0xff]  ;;  %v572_v28 = vld [vmem:[#allocation6 + $0x1d8] sm:$0xff] }
  0x24   : > { %490 = vmatpush.msra.mxu1 %v424_v11  ;;  %460 = vmatpush.msra.mxu0 %v440_v12  ;;  %v421_v23 = vld [vmem:[#allocation6 + $0x48] sm:$0xff]  ;;  %v519_v26 = vld [vmem:[#allocation6 + $0x140] sm:$0xff]  ;;  %v436_v29 = vld [vmem:[#allocation6 + $0xb8] sm:$0xff] }
  0x25   : > { %539 = vmatpush.msra.mxu2 %v522_v13  ;;  %578 = vmatpush.msra.mxu3 %v575_v19  ;;  %v420_v27 = vld [vmem:[#allocation6 + $0x40] sm:$0xff]  ;;  %v518_v30 = vld [vmem:[#allocation6 + $0x138] sm:$0xff]  ;;  %v571_v32 = vld [vmem:[#allocation6 + $0x1d0] sm:$0xff] }
  0x26   : > { %491 = vmatpush.msra.mxu1 %v423_v14  ;;  %461 = vmatpush.msra.mxu0 %v439_v16  ;;  %v419_v31 = vld [vmem:[#allocation6 + $0x38] sm:$0xff]  ;;  %v435_v33 = vld [vmem:[#allocation6 + $0xb0] sm:$0xff]  ;;  %v570_v36 = vld [vmem:[#allocation6 + $0x1c8] sm:$0xff] }
  0x27   : > { %540 = vmatpush.msra.mxu2 %v521_v17  ;;  %579 = vmatpush.msra.mxu3 %v574_v22  ;;  %v517_v34 = vld [vmem:[#allocation6 + $0x130] sm:$0xff]  ;;  %v434_v37 = vld [vmem:[#allocation6 + $0xa8] sm:$0xff]  ;;  %v569_v40 = vld [vmem:[#allocation6 + $0x1c0] sm:$0xff] }
  0x28   : > { %492 = vmatpush.msra.mxu1 %v422_v18  ;;  %462 = vmatpush.msra.mxu0 %v438_v20  ;;  %v418_v35 = vld [vmem:[#allocation6 + $0x30] sm:$0xff]  ;;  %v516_v38 = vld [vmem:[#allocation6 + $0x128] sm:$0xff]  ;;  %v433_v41 = vld [vmem:[#allocation6 + $0xa0] sm:$0xff] }
  0x29   : > { %541 = vmatpush.msra.mxu2 %v520_v21  ;;  %580 = vmatpush.msra.mxu3 %v573_v24  ;;  %v417_v39 = vld [vmem:[#allocation6 + $0x28] sm:$0xff]  ;;  %v515_v42 = vld [vmem:[#allocation6 + $0x120] sm:$0xff]  ;;  %v568_v44 = vld [vmem:[#allocation6 + $0x1b8] sm:$0xff] }
  0x2a   : > { %493 = vmatpush.msra.mxu1 %v421_v23  ;;  %463 = vmatpush.msra.mxu0 %v437_v25  ;;  %v416_v43 = vld [vmem:[#allocation6 + $0x20] sm:$0xff]  ;;  %v432_v45 = vld [vmem:[#allocation6 + $0x98] sm:$0xff]  ;;  %v567_v48 = vld [vmem:[#allocation6 + $0x1b0] sm:$0xff] }
  0x2b   : > { %542 = vmatpush.msra.mxu2 %v519_v26  ;;  %581 = vmatpush.msra.mxu3 %v572_v28  ;;  %v514_v46 = vld [vmem:[#allocation6 + $0x118] sm:$0xff]  ;;  %v431_v49 = vld [vmem:[#allocation6 + $0x90] sm:$0xff]  ;;  %v566_v52 = vld [vmem:[#allocation6 + $0x1a8] sm:$0xff] }
  0x2c   : > { %494 = vmatpush.msra.mxu1 %v420_v27  ;;  %464 = vmatpush.msra.mxu0 %v436_v29  ;;  %v415_v47 = vld [vmem:[#allocation6 + $0x18] sm:$0xff]  ;;  %v513_v50 = vld [vmem:[#allocation6 + $0x110] sm:$0xff]  ;;  %v430_v53 = vld [vmem:[#allocation6 + $0x88] sm:$0xff] }
  0x2d   : > { %543 = vmatpush.msra.mxu2 %v518_v30  ;;  %582 = vmatpush.msra.mxu3 %v571_v32  ;;  %v414_v51 = vld [vmem:[#allocation6 + $0x10] sm:$0xff]  ;;  %v512_v54 = vld [vmem:[#allocation6 + $0x108] sm:$0xff]  ;;  %v565_v56 = vld [vmem:[#allocation6 + $0x1a0] sm:$0xff] }
  0x2e   : > { %495 = vmatpush.msra.mxu1 %v419_v31  ;;  %465 = vmatpush.msra.mxu0 %v435_v33  ;;  %v413_v55 = vld [vmem:[#allocation6 + $0x8] sm:$0xff]  ;;  %v429_v57 = vld [vmem:[#allocation6 + $0x80] sm:$0xff]  ;;  %v618_v59 = vld [vmem:[#allocation6 + $0x278] sm:$0xff] }
  0x2f   : > { %544 = vmatpush.msra.mxu2 %v517_v34  ;;  %583 = vmatpush.msra.mxu3 %v570_v36  ;;  %v511_v58 = vld [vmem:[#allocation6 + $0x100] sm:$0xff]  ;;  %v719_v60 = vld [vmem:[#allocation6 + $0x378] sm:$0xff]  ;;  %v617_v0 = vld [vmem:[#allocation6 + $0x270] sm:$0xff] }
  0x30   : > { %496 = vmatpush.msra.mxu1 %v418_v35  ;;  %466 = vmatpush.msra.mxu0 %v434_v37  ;;  %v2157_v61 = vld [vmem:[%s2154_s21] sm:$0xff]  ;;  %v564_v63 = vld [vmem:[#allocation6 + $0x198] sm:$0xff]  ;;  %v718_v2 = vld [vmem:[#allocation6 + $0x370] sm:$0xff] }
  0x31   : > { %545 = vmatpush.msra.mxu2 %v516_v38  ;;  %584 = vmatpush.msra.mxu3 %v569_v40  ;;  %v412_v62 = vld [vmem:[#allocation6] sm:$0xff]  ;;  %v669_v1 = vld [vmem:[#allocation6 + $0x2f8] sm:$0xff]  ;;  %v563_v3 = vld [vmem:[#allocation6 + $0x190] sm:$0xff]  ;;  %v402_v4 = vperm.slane %v2157_v61, 0  ;;  %v450_v10 = vrot.slane %v2157_v61, 6  ;;  %v481_v20 = vrot.slane %v2157_v61, 5 }
  0x32   : > { %497 = vmatpush.msra.mxu1 %v417_v39  ;;  %467 = vmatpush.msra.mxu0 %v433_v41  ;;  %v616_v5 = vld [vmem:[#allocation6 + $0x268] sm:$0xff]  ;;  %v668_v6 = vld [vmem:[#allocation6 + $0x2f0] sm:$0xff]  ;;  %v615_v11 = vld [vmem:[#allocation6 + $0x260] sm:$0xff]  ;;  %v529_v24 = vrot.slane %v2157_v61, 7 }
  0x33   : > { %546 = vmatpush.msra.mxu2 %v515_v42  ;;  %585 = vmatpush.msra.mxu3 %v568_v44  ;;  %v717_v7 = vld [vmem:[#allocation6 + $0x368] sm:$0xff]  ;;  %v449_v9 = vrot.slane %v402_v4, 6  ;;  %v716_v13 = vld [vmem:[#allocation6 + $0x360] sm:$0xff]  ;;  %v614_v15 = vld [vmem:[#allocation6 + $0x258] sm:$0xff]  ;;  %v480_v19 = vrot.slane %v402_v4, 5  ;;  %v528_v23 = vrot.slane %v402_v4, 7 }
  0x34   : > { %498 = vmatpush.msra.mxu1 %v416_v43  ;;  %468 = vmatpush.msra.mxu0 %v432_v45  ;;  %v562_v8 = vld [vmem:[#allocation6 + $0x188] sm:$0xff]  ;;  %v561_v14 = vld [vmem:[#allocation6 + $0x180] sm:$0xff]  ;;  %v715_v17 = vld [vmem:[#allocation6 + $0x358] sm:$0xff]  ;;  %v721_v4 = vrot.slane %v2157_v61, 3 }
  0x35   : > { %547 = vmatpush.msra.mxu2 %v514_v46  ;;  %586 = vmatpush.msra.mxu3 %v567_v48  ;;  %v667_v12 = vld [vmem:[#allocation6 + $0x2e8] sm:$0xff]  ;;  %v666_v16 = vld [vmem:[#allocation6 + $0x2e0] sm:$0xff]  ;;  %v451_v18 = vsel %vm448_vm0, %v449_v9, %v450_v10  ;;  %v613_v21 = vld [vmem:[#allocation6 + $0x250] sm:$0xff]  ;;  %v482_v29 = vsel %vm479_vm1, %v480_v19, %v481_v20  ;;  %v530_v30 = vsel %vm527_vm2, %v528_v23, %v529_v24 }
  0x36   : > { %499 = vmatpush.msra.mxu1 %v415_v47  ;;  %469 = vmatpush.msra.mxu0 %v431_v49  ;;  %v665_v22 = vld [vmem:[#allocation6 + $0x2d8] sm:$0xff]  ;;  %v714_v25 = vld [vmem:[#allocation6 + $0x350] sm:$0xff]  ;;  %v612_v26 = vld [vmem:[#allocation6 + $0x248] sm:$0xff] }
  0x37   : > { %548 = vmatpush.msra.mxu2 %v513_v50  ;;  %587 = vmatpush.msra.mxu3 %v566_v52  ;;  %v664_v27 = vld [vmem:[#allocation6 + $0x2d0] sm:$0xff]  ;;  %v713_v28 = vld [vmem:[#allocation6 + $0x348] sm:$0xff]  ;;  %v611_v31 = vld [vmem:[#allocation6 + $0x240] sm:$0xff] }
  0x38   : > { %500 = vmatpush.msra.mxu1 %v414_v51  ;;  %470 = vmatpush.msra.mxu0 %v430_v53  ;;  %v663_v32 = vld [vmem:[#allocation6 + $0x2c8] sm:$0xff]  ;;  %v712_v33 = vld [vmem:[#allocation6 + $0x340] sm:$0xff]  ;;  %v610_v35 = vld [vmem:[#allocation6 + $0x238] sm:$0xff] }
  0x39   : > { %549 = vmatpush.msra.mxu2 %v512_v54  ;;  %588 = vmatpush.msra.mxu3 %v565_v56  ;;  %v2172_v34 = vld [vmem:[%s2154_s21 + $0x8] sm:$0xff]  ;;  %v834_v36 = vld [vmem:[#allocation8 + $0x1f0] sm:$0xff]  ;;  %v662_v37 = vld [vmem:[#allocation6 + $0x2c0] sm:$0xff] }
  0x3a   : > { %501 = vmatpush.msra.mxu1 %v413_v55  ;;  %471 = vmatpush.msra.mxu0 %v429_v57  ;;  %v711_v38 = vld [vmem:[#allocation6 + $0x338] sm:$0xff]  ;;  %v609_v39 = vld [vmem:[#allocation6 + $0x230] sm:$0xff]  ;;  %v531_v40 = vrot.slane %v2172_v34, 7  ;;  %v832_v41 = vld [vmem:[#allocation8 + $0x1e0] sm:$0xff]  ;;  %v452_v45 = vrot.slane %v2172_v34, 6  ;;  %v483_v46 = vrot.slane %v2172_v34, 5 }
  0x3b   : > { %550 = vmatpush.msra.mxu2 %v511_v58  ;;  %589 = vmatpush.msra.mxu3 %v564_v63  ;;  %v661_v42 = vld [vmem:[#allocation6 + $0x2b8] sm:$0xff]  ;;  %v710_v43 = vld [vmem:[#allocation6 + $0x330] sm:$0xff]  ;;  %v608_v44 = vld [vmem:[#allocation6 + $0x228] sm:$0xff]  ;;  %v621_v63 = vrot.slane %v2157_v61, 1 }
  0x3c   : > { %628 = vmatpush.msrb.mxu0 %v618_v59  ;;  %502 = vmatpush.msra.mxu1 %v412_v62  ;;  %v660_v47 = vld [vmem:[#allocation6 + $0x2b0] sm:$0xff]  ;;  %v709_v48 = vld [vmem:[#allocation6 + $0x328] sm:$0xff]  ;;  %v532_v49 = vsel %vm527_vm2, %v529_v24, %v531_v40  ;;  %v607_v50 = vld [vmem:[#allocation6 + $0x220] sm:$0xff]  ;;  %v453_v53 = vsel %vm448_vm0, %v450_v10, %v452_v45  ;;  %v484_v54 = vsel %vm479_vm1, %v481_v20, %v483_v46 }
  0x3d   : > { %728 = vmatpush.msrb.mxu2 %v719_v60  ;;  %590 = vmatpush.msra.mxu3 %v563_v3  ;;  %v659_v51 = vld [vmem:[#allocation6 + $0x2a8] sm:$0xff]  ;;  %v708_v52 = vld [vmem:[#allocation6 + $0x320] sm:$0xff]  ;;  %v606_v55 = vld [vmem:[#allocation6 + $0x218] sm:$0xff] }
  0x3e   : > { %629 = vmatpush.msrb.mxu0 %v617_v0  ;;  %678 = vmatpush.msrb.mxu1 %v669_v1  ;;  %v658_v56 = vld [vmem:[#allocation6 + $0x2a0] sm:$0xff]  ;;  %v707_v57 = vld [vmem:[#allocation6 + $0x318] sm:$0xff]  ;;  %v830_v58 = vld [vmem:[#allocation8 + $0x1d0] sm:$0xff]  ;;  %v622_v0 = vrot.slane %v2172_v34, 1 }
  0x3f   : > { %729 = vmatpush.msrb.mxu2 %v718_v2  ;;  %591 = vmatpush.msra.mxu3 %v562_v8  ;;  %v605_v59 = vld [vmem:[#allocation6 + $0x210] sm:$0xff]  ;;  %v657_v60 = vld [vmem:[#allocation6 + $0x298] sm:$0xff]  ;;  %v828_v1 = vld [vmem:[#allocation8 + $0x1c0] sm:$0xff]  ;;  %v672_v8 = vrot.slane %v2172_v34, 2 }
  0x40   : > { %630 = vmatpush.msrb.mxu0 %v616_v5  ;;  %679 = vmatpush.msrb.mxu1 %v668_v6  ;;  %v706_v62 = vld [vmem:[#allocation6 + $0x310] sm:$0xff]  ;;  %v604_v2 = vld [vmem:[#allocation6 + $0x208] sm:$0xff]  ;;  %v722_v5 = vrot.slane %v2172_v34, 3  ;;  %v603_v10 = vld [vmem:[#allocation6 + $0x200] sm:$0xff] }
  0x41   : > { %730 = vmatpush.msrb.mxu2 %v717_v7  ;;  %592 = vmatpush.msra.mxu3 %v561_v14  ;;  %v656_v3 = vld [vmem:[#allocation6 + $0x290] sm:$0xff]  ;;  %v705_v6 = vld [vmem:[#allocation6 + $0x308] sm:$0xff]  ;;  %v671_v7 = vrot.slane %v2157_v61, 2  ;;  %v406_v14 = vperm.slane %v2172_v34, 7  ;;  %v823_v45 = vld [vmem:[#allocation8 + $0x198] sm:$0xff] }
  0x42   : > { %631 = vmatpush.msrb.mxu0 %v615_v11  ;;  %680 = vmatpush.msrb.mxu1 %v667_v12  ;;  %v826_v9 = vld [vmem:[#allocation8 + $0x1b0] sm:$0xff]  ;;  %v655_v11 = vld [vmem:[#allocation6 + $0x288] sm:$0xff]  ;;  %v704_v12 = vld [vmem:[#allocation6 + $0x300] sm:$0xff] }
  0x43   : > { %731 = vmatpush.msrb.mxu2 %v716_v13  ;;  %472 = vmatmul.f32.vlgmr.msra.gmra.mxu0 %v451_v18  ;;  %v623_v13 = vsel %vm620_vm3, %v621_v63, %v622_v0  ;;  %v824_v18 = vld [vmem:[#allocation8 + $0x1a0] sm:$0xff]  ;;  %v801_v19 = vld [vmem:[#allocation8 + $0xf0] sm:$0xff]  ;;  %v624_v20 = vrot.slane %v406_v14, 1  ;;  %v724_v23 = vrot.slane %v406_v14, 3  ;;  %v796_v40 = vld [vmem:[#allocation8 + $0xc8] sm:$0xff] }
  0x44   : > { %632 = vmatpush.msrb.mxu0 %v614_v15  ;;  %681 = vmatpush.msrb.mxu1 %v666_v16  ;;  %v723_v15 = vsel %vm720_vm4, %v721_v4, %v722_v5  ;;  %v654_v16 = vld [vmem:[#allocation6 + $0x280] sm:$0xff]  ;;  %v822_v24 = vld [vmem:[#allocation8 + $0x190] sm:$0xff]  ;;  %v786_v4 = vld [vmem:[#allocation8 + $0x78] sm:$0xff] }
  0x45   : > { %732 = vmatpush.msrb.mxu2 %v715_v17  ;;  %593 = vmatmul.f32.vlgmr.msra.gmra.mxu3 %v2157_v61  ;;  %v673_v61 = vsel %vm670_vm5, %v671_v7, %v672_v8  ;;  %v835_v17 = vld [vmem:[#allocation8 + $0x1f8] sm:$0xff]  ;;  %v791_v46 = vld [vmem:[#allocation8 + $0xa0] sm:$0xff] }
  0x46   : > { %633 = vmatpush.msrb.mxu0 %v613_v21  ;;  %682 = vmatpush.msrb.mxu1 %v665_v22  ;;  %v833_v21 = vld [vmem:[#allocation8 + $0x1e8] sm:$0xff]  ;;  %v802_v22 = vld [vmem:[#allocation8 + $0xf8] sm:$0xff]  ;;  %v787_v63 = vld [vmem:[#allocation8 + $0x80] sm:$0xff] }
  0x47   : > { %733 = vmatpush.msrb.mxu2 %v714_v25  ;;  %503 = vmatmul.f32.vlgmr.msra.gmra.mxu1 %v482_v29  ;;  %v799_v25 = vld [vmem:[#allocation8 + $0xe0] sm:$0xff] }
  0x48   : > { %634 = vmatpush.msrb.mxu0 %v612_v26  ;;  %683 = vmatpush.msrb.mxu1 %v664_v27  ;;  %v674_v26 = vrot.slane %v406_v14, 2  ;;  %v831_v27 = vld [vmem:[#allocation8 + $0x1d8] sm:$0xff]  ;;  %v820_v29 = vld [vmem:[#allocation8 + $0x180] sm:$0xff] }
  0x49   : > { %734 = vmatpush.msrb.mxu2 %v713_v28  ;;  %846 = vmatpush.msrb.mxu3 %v834_v36  ;;  %v800_v28 = vld [vmem:[#allocation8 + $0xe8] sm:$0xff]  ;;  %v818_v36 = vld [vmem:[#allocation8 + $0x170] sm:$0xff]  ;;  %v783_v7 = vld [vmem:[#allocation8 + $0x60] sm:$0xff] }
  0x4a   : > { %551 = vmatmul.f32.vlgmr.msra.gmra.mxu2 %v530_v30  ;;  %635 = vmatpush.msrb.mxu0 %v611_v31  ;;  %v797_v30 = vld [vmem:[#allocation8 + $0xd0] sm:$0xff]  ;;  %v625_v31 = vsel %vm620_vm3, %v622_v0, %v624_v20  ;;  %v788_v0 = vld [vmem:[#allocation8 + $0x88] sm:$0xff]  ;;  %v973_v14 = vld [vmem:[#allocation8 + $0x2d8] sm:$0xff] }
  0x4b   : > { %684 = vmatpush.msrb.mxu1 %v663_v32  ;;  %735 = vmatpush.msrb.mxu2 %v712_v33  ;;  %v798_v32 = vld [vmem:[#allocation8 + $0xd8] sm:$0xff]  ;;  %v725_v33 = vsel %vm720_vm4, %v722_v5, %v724_v23  ;;  %v976_v5 = vld [vmem:[#allocation8 + $0x2f0] sm:$0xff]  ;;  %v776_v23 = vld [vmem:[#allocation8 + $0x28] sm:$0xff] }
  0x4c   : > { %636 = vmatpush.msrb.mxu0 %v610_v35  ;;  %847 = vmatpush.msrb.mxu3 %v832_v41  ;;  %v675_v35 = vsel %vm670_vm5, %v672_v8, %v674_v26  ;;  %v825_v41 = vld [vmem:[#allocation8 + $0x1a8] sm:$0xff]  ;;  %v968_v20 = vld [vmem:[#allocation8 + $0x2b0] sm:$0xff] }
  0x4d   : > { %685 = vmatpush.msrb.mxu1 %v662_v37  ;;  %736 = vmatpush.msrb.mxu2 %v711_v38  ;;  %v827_v37 = vld [vmem:[#allocation8 + $0x1b8] sm:$0xff]  ;;  %v795_v38 = vld [vmem:[#allocation8 + $0xc0] sm:$0xff]  ;;  %v784_v8 = vld [vmem:[#allocation8 + $0x68] sm:$0xff] }
  0x4e   : > { %637 = vmatpush.msrb.mxu0 %v609_v39  ;;  %596 = vmatmul.f32.gmra.mxu3 %v2172_v34  ;;  %v829_v34 = vld [vmem:[#allocation8 + $0x1c8] sm:$0xff]  ;;  %v816_v39 = vld [vmem:[#allocation8 + $0x160] sm:$0xff]  ;;  %v773_v26 = vld [vmem:[#allocation8 + $0x10] sm:$0xff] }
  0x4f   : > { %686 = vmatpush.msrb.mxu1 %v661_v42  ;;  %737 = vmatpush.msrb.mxu2 %v710_v43  ;;  %v793_v42 = vld [vmem:[#allocation8 + $0xb0] sm:$0xff] }
  0x50   : > { %638 = vmatpush.msrb.mxu0 %v608_v44  ;;  %506 = vmatmul.f32.gmra.mxu1 %v484_v54  ;;  %v814_v43 = vld [vmem:[#allocation8 + $0x150] sm:$0xff]  ;;  %v794_v44 = vld [vmem:[#allocation8 + $0xb8] sm:$0xff] }
  0x51   : > { %687 = vmatpush.msrb.mxu1 %v660_v47  ;;  %738 = vmatpush.msrb.mxu2 %v709_v48  ;;  %v812_v47 = vld [vmem:[#allocation8 + $0x140] sm:$0xff]  ;;  %v792_v48 = vld [vmem:[#allocation8 + $0xa8] sm:$0xff]  ;;  %v815_v54 = vld [vmem:[#allocation8 + $0x158] sm:$0xff] }
  0x52   : > { %554 = vmatmul.f32.gmra.mxu2 %v532_v49  ;;  %639 = vmatpush.msrb.mxu0 %v607_v50  ;;  %v821_v49 = vld [vmem:[#allocation8 + $0x188] sm:$0xff]  ;;  %v810_v50 = vld [vmem:[#allocation8 + $0x130] sm:$0xff] }
  0x53   : > { %688 = vmatpush.msrb.mxu1 %v659_v51  ;;  %739 = vmatpush.msrb.mxu2 %v708_v52  ;;  %v819_v51 = vld [vmem:[#allocation8 + $0x178] sm:$0xff]  ;;  %v808_v52 = vld [vmem:[#allocation8 + $0x120] sm:$0xff] }
  0x54   : > { %475 = vmatmul.f32.gmra.mxu0 %v453_v53  ;;  %848 = vmatpush.msrb.mxu3 %v830_v58  ;;  %v817_v53 = vld [vmem:[#allocation8 + $0x168] sm:$0xff]  ;;  %v789_v58 = vld [vmem:[#allocation8 + $0x90] sm:$0xff] }
  0x55   : > { %640 = vmatpush.msrb.mxu0 %v606_v55  ;;  %689 = vmatpush.msrb.mxu1 %v658_v56  ;;  %v813_v55 = vld [vmem:[#allocation8 + $0x148] sm:$0xff]  ;;  %v811_v56 = vld [vmem:[#allocation8 + $0x138] sm:$0xff] }
  0x56   : > { %740 = vmatpush.msrb.mxu2 %v707_v57  ;;  %849 = vmatpush.msrb.mxu3 %v828_v1  ;;  %v809_v57 = vld [vmem:[#allocation8 + $0x128] sm:$0xff]  ;;  %v804_v1 = vld [vmem:[#allocation8 + $0x100] sm:$0xff] }
  0x57   : > { %641 = vmatpush.msrb.mxu0 %v605_v59  ;;  %690 = vmatpush.msrb.mxu1 %v657_v60  ;;  %v790_v59 = vld [vmem:[#allocation8 + $0x98] sm:$0xff]  ;;  %v806_v60 = vld [vmem:[#allocation8 + $0x110] sm:$0xff] }
  0x58   : > { %741 = vmatpush.msrb.mxu2 %v706_v62  ;;  %850 = vmatpush.msrb.mxu3 %v826_v9  ;;  %v807_v62 = vld [vmem:[#allocation8 + $0x118] sm:$0xff]  ;;  %v974_v9 = vld [vmem:[#allocation8 + $0x2e0] sm:$0xff] }
  0x59   : > { %642 = vmatpush.msrb.mxu0 %v604_v2  ;;  %691 = vmatpush.msrb.mxu1 %v656_v3  ;;  %v805_v2 = vld [vmem:[#allocation8 + $0x108] sm:$0xff]  ;;  %v785_v3 = vld [vmem:[#allocation8 + $0x70] sm:$0xff] }
  0x5a   : > { %742 = vmatpush.msrb.mxu2 %v705_v6  ;;  %851 = vmatpush.msrb.mxu3 %v824_v18  ;;  %v977_v6 = vld [vmem:[#allocation8 + $0x2f8] sm:$0xff]  ;;  %v777_v18 = vld [vmem:[#allocation8 + $0x30] sm:$0xff] }
  0x5b   : > { %643 = vmatpush.msrb.mxu0 %v603_v10  ;;  %692 = vmatpush.msrb.mxu1 %v655_v11  ;;  %v975_v10 = vld [vmem:[#allocation8 + $0x2e8] sm:$0xff]  ;;  %v781_v11 = vld [vmem:[#allocation8 + $0x50] sm:$0xff] }
  0x5c   : > { %743 = vmatpush.msrb.mxu2 %v704_v12  ;;  %644 = vmatmul.f32.vlgmr.msrb.gmra.mxu0 %v623_v13  ;;  %v782_v12 = vld [vmem:[#allocation8 + $0x58] sm:$0xff]  ;;  %v972_v13 = vld [vmem:[#allocation8 + $0x2d0] sm:$0xff] }
  0x5d   : > { %744 = vmatmul.f32.vlgmr.msrb.gmra.mxu2 %v723_v15  ;;  %693 = vmatpush.msrb.mxu1 %v654_v16  ;;  %v779_v15 = vld [vmem:[#allocation8 + $0x40] sm:$0xff]  ;;  %v780_v16 = vld [vmem:[#allocation8 + $0x48] sm:$0xff] }
  0x5e   : > { %694 = vmatmul.f32.vlgmr.msrb.gmra.mxu1 %v673_v61  ;;  %869 = vmatpush.msra.mxu0 %v835_v17  ;;  %v970_v61 = vld [vmem:[#allocation8 + $0x2c0] sm:$0xff]  ;;  %v971_v17 = vld [vmem:[#allocation8 + $0x2c8] sm:$0xff] }
  0x5f   : > { %899 = vmatpush.msra.mxu1 %v801_v19  ;;  %922 = vmatpush.msra.mxu2 %v802_v22  ;;  %v778_v19 = vld [vmem:[#allocation8 + $0x38] sm:$0xff]  ;;  %v775_v22 = vld [vmem:[#allocation8 + $0x20] sm:$0xff] }
  0x60   : > { %870 = vmatpush.msra.mxu0 %v833_v21  ;;  %852 = vmatpush.msrb.mxu3 %v822_v24  ;;  %v969_v21 = vld [vmem:[#allocation8 + $0x2b8] sm:$0xff]  ;;  %v966_v24 = vld [vmem:[#allocation8 + $0x2a0] sm:$0xff] }
  0x61   : > { %900 = vmatpush.msra.mxu1 %v799_v25  ;;  %923 = vmatpush.msra.mxu2 %v800_v28  ;;  %v967_v25 = vld [vmem:[#allocation8 + $0x2a8] sm:$0xff]  ;;  %v964_v28 = vld [vmem:[#allocation8 + $0x290] sm:$0xff] }
  0x62   : > { %871 = vmatpush.msra.mxu0 %v831_v27  ;;  %853 = vmatpush.msrb.mxu3 %v820_v29  ;;  %v774_v27 = vld [vmem:[#allocation8 + $0x18] sm:$0xff] }
  0x63   : > { %901 = vmatpush.msra.mxu1 %v797_v30  ;;  %924 = vmatpush.msra.mxu2 %v798_v32  ;;  %v965_v29 = vld [vmem:[#allocation8 + $0x298] sm:$0xff]  ;;  %v771_v30 = vld [vmem:[#allocation8] sm:$0xff] }
  0x64   : > { %647 = vmatmul.f32.gmra.mxu0 %v625_v31  ;;  %854 = vmatpush.msrb.mxu3 %v818_v36  ;;  %v772_v31 = vld [vmem:[#allocation8 + $0x8] sm:$0xff]  ;;  %v962_v32 = vld [vmem:[#allocation8 + $0x280] sm:$0xff]  ;;  %v960_v36 = vld [vmem:[#allocation8 + $0x270] sm:$0xff] }
  0x65   : > { %747 = vmatmul.f32.gmra.mxu2 %v725_v33  ;;  %872 = vmatpush.msra.mxu0 %v829_v34  ;;  %v963_v33 = vld [vmem:[#allocation8 + $0x288] sm:$0xff]  ;;  %v1059_v34 = vld [vmem:[#allocation8 + $0x3f0] sm:$0xff] }
  0x66   : > { %697 = vmatmul.f32.gmra.mxu1 %v675_v35  ;;  %855 = vmatpush.msrb.mxu3 %v816_v39  ;;  %v1060_v35 = vld [vmem:[#allocation8 + $0x3f8] sm:$0xff]  ;;  %v1058_v39 = vld [vmem:[#allocation8 + $0x3e8] sm:$0xff] }
  0x67   : > { %873 = vmatpush.msra.mxu0 %v827_v37  ;;  %902 = vmatpush.msra.mxu1 %v795_v38  ;;  %v961_v37 = vld [vmem:[#allocation8 + $0x278] sm:$0xff]  ;;  %v1057_v38 = vld [vmem:[#allocation8 + $0x3e0] sm:$0xff] }
  0x68   : > { %925 = vmatpush.msra.mxu2 %v796_v40  ;;  %856 = vmatpush.msrb.mxu3 %v814_v43  ;;  %v958_v40 = vld [vmem:[#allocation8 + $0x260] sm:$0xff]  ;;  %v1056_v43 = vld [vmem:[#allocation8 + $0x3d8] sm:$0xff] }
  0x69   : > { %874 = vmatpush.msra.mxu0 %v825_v41  ;;  %903 = vmatpush.msra.mxu1 %v793_v42  ;;  %v959_v41 = vld [vmem:[#allocation8 + $0x268] sm:$0xff]  ;;  %v1055_v42 = vld [vmem:[#allocation8 + $0x3d0] sm:$0xff] }
  0x6a   : > { %926 = vmatpush.msra.mxu2 %v794_v44  ;;  %857 = vmatpush.msrb.mxu3 %v812_v47  ;;  %v956_v44 = vld [vmem:[#allocation8 + $0x250] sm:$0xff]  ;;  %v1054_v47 = vld [vmem:[#allocation8 + $0x3c8] sm:$0xff] }
  0x6b   : > { %875 = vmatpush.msra.mxu0 %v823_v45  ;;  %904 = vmatpush.msra.mxu1 %v791_v46  ;;  %v957_v45 = vld [vmem:[#allocation8 + $0x258] sm:$0xff]  ;;  %v1053_v46 = vld [vmem:[#allocation8 + $0x3c0] sm:$0xff] }
  0x6c   : > { %927 = vmatpush.msra.mxu2 %v792_v48  ;;  %858 = vmatpush.msrb.mxu3 %v810_v50  ;;  %v954_v48 = vld [vmem:[#allocation8 + $0x240] sm:$0xff]  ;;  %v1051_v50 = vld [vmem:[#allocation8 + $0x3b0] sm:$0xff] }
  0x6d   : > { %876 = vmatpush.msra.mxu0 %v821_v49  ;;  %905 = vmatpush.msra.mxu1 %v789_v58  ;;  %v955_v49 = vld [vmem:[#allocation8 + $0x248] sm:$0xff]  ;;  %v950_v58 = vld [vmem:[#allocation8 + $0x220] sm:$0xff] }
  0x6e   : > { %859 = vmatpush.msrb.mxu3 %v808_v52  ;;  %928 = vmatpush.msra.mxu2 %v790_v59  ;;  %v952_v52 = vld [vmem:[#allocation8 + $0x230] sm:$0xff]  ;;  %v951_v59 = vld [vmem:[#allocation8 + $0x228] sm:$0xff] }
  0x6f   : > { %877 = vmatpush.msra.mxu0 %v819_v51  ;;  %906 = vmatpush.msra.mxu1 %v787_v63  ;;  %v1052_v51 = vld [vmem:[#allocation8 + $0x3b8] sm:$0xff]  ;;  %v948_v63 = vld [vmem:[#allocation8 + $0x210] sm:$0xff] }
  0x70   : > { %860 = vmatpush.msrb.mxu3 %v806_v60  ;;  %929 = vmatpush.msra.mxu2 %v788_v0  ;;  %v1047_v60 = vld [vmem:[#allocation8 + $0x390] sm:$0xff]  ;;  %v949_v0 = vld [vmem:[#allocation8 + $0x218] sm:$0xff] }
  0x71   : > { %878 = vmatpush.msra.mxu0 %v817_v53  ;;  %907 = vmatpush.msra.mxu1 %v785_v3  ;;  %v953_v53 = vld [vmem:[#allocation8 + $0x238] sm:$0xff]  ;;  %v946_v3 = vld [vmem:[#allocation8 + $0x200] sm:$0xff] }
  0x72   : > { %861 = vmatpush.msrb.mxu3 %v804_v1  ;;  %930 = vmatpush.msra.mxu2 %v786_v4  ;;  %v1045_v1 = vld [vmem:[#allocation8 + $0x380] sm:$0xff]  ;;  %v947_v4 = vld [vmem:[#allocation8 + $0x208] sm:$0xff] }
  0x73   : > { %879 = vmatpush.msra.mxu0 %v815_v54  ;;  %908 = vmatpush.msra.mxu1 %v783_v7  ;;  %v1049_v54 = vld [vmem:[#allocation8 + $0x3a0] sm:$0xff] }
  0x74   : > { %978 = vmatpush.msra.mxu3 %v976_v5  ;;  %931 = vmatpush.msra.mxu2 %v784_v8  ;;  %v1043_v5 = vld [vmem:[#allocation8 + $0x370] sm:$0xff]  ;;  %v1041_v8 = vld [vmem:[#allocation8 + $0x360] sm:$0xff] }
  0x75   : > { %880 = vmatpush.msra.mxu0 %v813_v55  ;;  %909 = vmatpush.msra.mxu1 %v781_v11  ;;  %v1050_v55 = vld [vmem:[#allocation8 + $0x3a8] sm:$0xff]  ;;  %v1040_v11 = vld [vmem:[#allocation8 + $0x358] sm:$0xff] }
  0x76   : > { %979 = vmatpush.msra.mxu3 %v974_v9  ;;  %932 = vmatpush.msra.mxu2 %v782_v12  ;;  %v1042_v9 = vld [vmem:[#allocation8 + $0x368] sm:$0xff] }
  0x77   : > { %881 = vmatpush.msra.mxu0 %v811_v56  ;;  %910 = vmatpush.msra.mxu1 %v779_v15  ;;  %v1037_v15 = vld [vmem:[#allocation8 + $0x340] sm:$0xff] }
  0x78   : > { %980 = vmatpush.msra.mxu3 %v972_v13  ;;  %933 = vmatpush.msra.mxu2 %v780_v16  ;;  %v1038_v16 = vld [vmem:[#allocation8 + $0x348] sm:$0xff] }
  0x79   : > { %882 = vmatpush.msra.mxu0 %v809_v57  ;;  %911 = vmatpush.msra.mxu1 %v777_v18  ;;  %v1035_v18 = vld [vmem:[#allocation8 + $0x330] sm:$0xff] }
  0x7a   : > { %981 = vmatpush.msra.mxu3 %v970_v61  ;;  %934 = vmatpush.msra.mxu2 %v778_v19  ;;  %v1036_v19 = vld [vmem:[#allocation8 + $0x338] sm:$0xff] }
  0x7b   : > { %883 = vmatpush.msra.mxu0 %v807_v62  ;;  %912 = vmatpush.msra.mxu1 %v775_v22  ;;  %v1048_v62 = vld [vmem:[#allocation8 + $0x398] sm:$0xff] }
  0x7c   : > { %982 = vmatpush.msra.mxu3 %v968_v20  ;;  %935 = vmatpush.msra.mxu2 %v776_v23  ;;  %v1033_v20 = vld [vmem:[#allocation8 + $0x320] sm:$0xff] }
  0x7d   : > { %884 = vmatpush.msra.mxu0 %v805_v2  ;;  %913 = vmatpush.msra.mxu1 %v773_v26  ;;  %v1046_v2 = vld [vmem:[#allocation8 + $0x388] sm:$0xff]  ;;  %v1031_v26 = vld [vmem:[#allocation8 + $0x310] sm:$0xff] }
  0x7e   : > { %983 = vmatpush.msra.mxu3 %v966_v24  ;;  %936 = vmatpush.msra.mxu2 %v774_v27  ;;  %v1032_v27 = vld [vmem:[#allocation8 + $0x318] sm:$0xff] }
  0x7f   : > { %1001 = vmatpush.msrb.mxu0 %v977_v6  ;;  %914 = vmatpush.msra.mxu1 %v771_v30  ;;  %v1044_v6 = vld [vmem:[#allocation8 + $0x378] sm:$0xff]  ;;  %v1029_v30 = vld [vmem:[#allocation8 + $0x300] sm:$0xff] }
  0x80   : > { %984 = vmatpush.msra.mxu3 %v964_v28  ;;  %937 = vmatpush.msra.mxu2 %v772_v31  ;;  %v1030_v31 = vld [vmem:[#allocation8 + $0x308] sm:$0xff] }
  0x81   : > { %1002 = vmatpush.msrb.mxu0 %v975_v10  ;;  %1069 = vmatpush.msrb.mxu1 %v1059_v34  ;;  %v1039_v10 = vld [vmem:[#allocation8 + $0x350] sm:$0xff] }
  0x82   : > { %985 = vmatpush.msra.mxu3 %v962_v32  ;;  %1092 = vmatpush.msrb.mxu2 %v1060_v35  ;;  %v1884_v35 = vld [vmem:[%s2273_s2] ss:$0 sm:$0xff] }
  0x83   : > { %1003 = vmatpush.msrb.mxu0 %v973_v14  ;;  %1070 = vmatpush.msrb.mxu1 %v1057_v38 }
  0x84   : > { %986 = vmatpush.msra.mxu3 %v960_v36  ;;  %1093 = vmatpush.msrb.mxu2 %v1058_v39 }
  0x85   : > { %1004 = vmatpush.msrb.mxu0 %v971_v17  ;;  %1071 = vmatpush.msrb.mxu1 %v1055_v42 }
  0x86   : > { %987 = vmatpush.msra.mxu3 %v958_v40  ;;  %1094 = vmatpush.msrb.mxu2 %v1056_v43 }
  0x87   : > { %1005 = vmatpush.msrb.mxu0 %v969_v21  ;;  %1072 = vmatpush.msrb.mxu1 %v1053_v46  ;;  %v1034_v21 = vld [vmem:[#allocation8 + $0x328] sm:$0xff] }
  0x88   : > { %988 = vmatpush.msra.mxu3 %v956_v44  ;;  %1095 = vmatpush.msrb.mxu2 %v1054_v47 }
  0x89   : > { %1006 = vmatpush.msrb.mxu0 %v967_v25  ;;  %1073 = vmatpush.msrb.mxu1 %v1051_v50 }
  0x8a   : > { %989 = vmatpush.msra.mxu3 %v954_v48  ;;  %1096 = vmatpush.msrb.mxu2 %v1052_v51 }
  0x8b   : > { %1007 = vmatpush.msrb.mxu0 %v965_v29  ;;  %1074 = vmatpush.msrb.mxu1 %v1049_v54 }
  0x8c   : > { %990 = vmatpush.msra.mxu3 %v952_v52  ;;  %1097 = vmatpush.msrb.mxu2 %v1050_v55  ;;  %v1150_v55 = vld [vmem:[#allocation8 + $0x4f0] sm:$0xff] }
  0x8d   : > { %1008 = vmatpush.msrb.mxu0 %v963_v33  ;;  %1075 = vmatpush.msrb.mxu1 %v1047_v60  ;;  %v1146_v60 = vld [vmem:[#allocation8 + $0x4d0] sm:$0xff] }
  0x8e   : > { %991 = vmatpush.msra.mxu3 %v950_v58  ;;  %1098 = vmatpush.msrb.mxu2 %v1048_v62  ;;  %v1148_v58 = vld [vmem:[#allocation8 + $0x4e0] sm:$0xff]  ;;  %v1147_v62 = vld [vmem:[#allocation8 + $0x4d8] sm:$0xff] }
  0x8f   : > { %1009 = vmatpush.msrb.mxu0 %v961_v37  ;;  %1076 = vmatpush.msrb.mxu1 %v1045_v1  ;;  %v1145_v1 = vld [vmem:[#allocation8 + $0x4c8] sm:$0xff] }
  0x90   : > { %992 = vmatpush.msra.mxu3 %v948_v63  ;;  %1099 = vmatpush.msrb.mxu2 %v1046_v2 }
  0x91   : > { %1010 = vmatpush.msrb.mxu0 %v959_v41  ;;  %1077 = vmatpush.msrb.mxu1 %v1043_v5  ;;  %v1143_v5 = vld [vmem:[#allocation8 + $0x4b8] sm:$0xff] }
  0x92   : > { %993 = vmatpush.msra.mxu3 %v946_v3  ;;  %1100 = vmatpush.msrb.mxu2 %v1044_v6 }
  0x93   : > { %1011 = vmatpush.msrb.mxu0 %v957_v45  ;;  %1078 = vmatpush.msrb.mxu1 %v1041_v8  ;;  %v1141_v8 = vld [vmem:[#allocation8 + $0x4a8] sm:$0xff] }
  0x94   : > { %1101 = vmatpush.msrb.mxu2 %v1042_v9  ;;  %v1138_v9 = vld [vmem:[#allocation8 + $0x490] sm:$0xff] }
  0x95   : > { %1012 = vmatpush.msrb.mxu0 %v955_v49  ;;  %1079 = vmatpush.msrb.mxu1 %v1039_v10  ;;  %v1139_v10 = vld [vmem:[#allocation8 + $0x498] sm:$0xff] }
  0x96   : > { %1102 = vmatpush.msrb.mxu2 %v1040_v11  ;;  %v1307_v11 = vld [vmem:[#allocation10 + $0x1f8] sm:$0xff] }
  0x97   : > { %1013 = vmatpush.msrb.mxu0 %v953_v53  ;;  %1080 = vmatpush.msrb.mxu1 %v1037_v15  ;;  %v1137_v15 = vld [vmem:[#allocation8 + $0x488] sm:$0xff] }
  0x98   : > { %1103 = vmatpush.msrb.mxu2 %v1038_v16 }
  0x99   : > { %1014 = vmatpush.msrb.mxu0 %v951_v59  ;;  %1081 = vmatpush.msrb.mxu1 %v1035_v18  ;;  %v1149_v59 = vld [vmem:[#allocation8 + $0x4e8] sm:$0xff]  ;;  %v1135_v18 = vld [vmem:[#allocation8 + $0x478] sm:$0xff] }
  0x9a   : > { %1104 = vmatpush.msrb.mxu2 %v1036_v19 }
  0x9b   : > { %1015 = vmatpush.msrb.mxu0 %v949_v0  ;;  %1082 = vmatpush.msrb.mxu1 %v1033_v20  ;;  %v1144_v0 = vld [vmem:[#allocation8 + $0x4c0] sm:$0xff]  ;;  %v1305_v20 = vld [vmem:[#allocation10 + $0x1e8] sm:$0xff] }
  0x9c   : > { %1105 = vmatpush.msrb.mxu2 %v1034_v21  ;;  %v1132_v21 = vld [vmem:[#allocation8 + $0x460] sm:$0xff] }
  0x9d   : > { %1016 = vmatpush.msrb.mxu0 %v947_v4  ;;  %1083 = vmatpush.msrb.mxu1 %v1031_v26  ;;  %v1142_v4 = vld [vmem:[#allocation8 + $0x4b0] sm:$0xff]  ;;  %v1131_v26 = vld [vmem:[#allocation8 + $0x458] sm:$0xff] }
  0x9e   : > { %1106 = vmatpush.msrb.mxu2 %v1032_v27  ;;  %v1128_v27 = vld [vmem:[#allocation8 + $0x440] sm:$0xff] }
  0x9f   : > { %1084 = vmatpush.msrb.mxu1 %v1029_v30  ;;  %v1126_v30 = vld [vmem:[#allocation8 + $0x430] sm:$0xff] }
  0xa0   : > { %1107 = vmatpush.msrb.mxu2 %v1030_v31  ;;  %v1127_v31 = vld [vmem:[#allocation8 + $0x438] sm:$0xff] }
  0xc0   : > { %v473_v56 = vpop.f32.mrf.mxu0 }
  0xc4   : > { %v504_v57 = vpop.f32.mrf.mxu1 }
  0xc5   : > { %v505_v12 = vadd.f32 %v504_v57, %v473_v56  ;;  %v1151_v56 = vld [vmem:[#allocation8 + $0x4f8] sm:$0xff] }
  0xc8   : > { %v594_v61 = vpop.f32.mrf.mxu3 }
  0xcd   : > { %v552_v7 = vpop.f32.mrf.mxu2  ;;  %v507_v14 = vpop.f32.mrf.mxu1 }
  0xce   : > { %v558_v17 = vadd.f32 %v552_v7, %v505_v12  ;;  %v1140_v7 = vld [vmem:[#allocation8 + $0x4a0] sm:$0xff]  ;;  %v1306_v12 = vld [vmem:[#allocation10 + $0x1f0] sm:$0xff] }
  0xd0   : > { %v600_v23 = vadd.f32 %v594_v61, %v558_v17  ;;  %v1134_v17 = vld [vmem:[#allocation8 + $0x470] sm:$0xff] }
  0xd1   : > { %v476_v13 = vpop.f32.mrf.mxu0  ;;  %v597_v33 = vpop.f32.mrf.mxu3 }
  0xd2   : > { %v508_v24 = vadd.f32 %v507_v14, %v476_v13  ;;  %v1291_v13 = vld [vmem:[#allocation10 + $0x178] sm:$0xff]  ;;  %v1136_v14 = vld [vmem:[#allocation8 + $0x480] sm:$0xff] }
  0xd5   : > { %v555_v22 = vpop.f32.mrf.mxu2 }
  0xd6   : > { %v559_v32 = vadd.f32 %v555_v22, %v508_v24  ;;  %v1133_v22 = vld [vmem:[#allocation8 + $0x468] sm:$0xff]  ;;  %v1304_v24 = vld [vmem:[#allocation10 + $0x1e0] sm:$0xff] }
  0xd8   : > { %v601_v37 = vadd.f32 %v597_v33, %v559_v32  ;;  %v1124_v33 = vld [vmem:[#allocation8 + $0x420] sm:$0xff] }
  0xd9   : > { %v645_v25 = vpop.f32.mrf.mxu0 }
  0xda   : > { %v651_v28 = vadd.f32 %v645_v25, %v600_v23  ;;  %v1130_v25 = vld [vmem:[#allocation8 + $0x450] sm:$0xff] }
  0xdb   : > { %v695_v29 = vpop.f32.mrf.mxu1 }
  0xdc   : > { %v701_v34 = vadd.f32 %v695_v29, %v651_v28  ;;  %v1129_v28 = vld [vmem:[#allocation8 + $0x448] sm:$0xff] }
  0xe0   : > { %v745_v36 = vpop.f32.mrf.mxu2 }
  0xe1   : > { %v751_v38 = vadd.f32 %v745_v36, %v701_v34  ;;  %v648_v39 = vpop.f32.mrf.mxu0  ;;  %v1125_v34 = vld [vmem:[#allocation8 + $0x428] sm:$0xff]  ;;  %v1123_v36 = vld [vmem:[#allocation8 + $0x418] sm:$0xff] }
  0xe2   : > { %v652_v41 = vadd.f32 %v648_v39, %v601_v37  ;;  %v1121_v39 = vld [vmem:[#allocation8 + $0x408] sm:$0xff] }
  0xe3   : > { %v757_v40 = vadd.f32 %v1884_v35, %v751_v38  ;;  %v698_v42 = vpop.f32.mrf.mxu1  ;;  %v1120_v38 = vld [vmem:[#allocation8 + $0x400] sm:$0xff] }
  0xe4   : > { %v702_v44 = vadd.f32 %v698_v42, %v652_v41 }
  0xe5   : > { %v2201_v43 = vmax.f32 %v757_v40, 0.0 }
  0xe7   : > { %v761_v45 = vperm.slane %v2201_v43, 0  ;;  %v840_v47 = vrot.slane %v2201_v43, 7  ;;  %v893_v51 = vrot.slane %v2201_v43, 6  ;;  %v1062_v61 = vrot.slane %v2201_v43, 1 }
  0xe8   : > { %v748_v46 = vpop.f32.mrf.mxu2  ;;  %v1152_v40 = vrot.slane %v2201_v43, 2 }
  0xe9   : > { %v752_v48 = vadd.f32 %v748_v46, %v702_v44  ;;  %v839_v49 = vrot.slane %v761_v45, 7  ;;  %v892_v50 = vrot.slane %v761_v45, 6  ;;  %v1290_v45 = vld [vmem:[#allocation10 + $0x170] sm:$0xff]  ;;  %v1303_v46 = vld [vmem:[#allocation10 + $0x1d8] sm:$0xff] }
  0xeb   : > { %v758_v52 = vadd.f32 %v1884_v35, %v752_v48  ;;  %v841_v53 = vsel %vm527_vm2, %v839_v49, %v840_v47  ;;  %v894_v54 = vsel %vm448_vm0, %v892_v50, %v893_v51  ;;  %v1122_v35 = vld [vmem:[#allocation8 + $0x410] sm:$0xff]  ;;  %v1288_v49 = vld [vmem:[#allocation10 + $0x160] sm:$0xff]  ;;  %v1301_v50 = vld [vmem:[#allocation10 + $0x1c8] sm:$0xff] }
  0xec   : > { %862 = vmatmul.f32.vlgmr.msrb.gmra.mxu3 %v841_v53  ;;  %885 = vmatmul.f32.vlgmr.msra.gmra.mxu0 %v841_v53  ;;  %v1302_v48 = vld [vmem:[#allocation10 + $0x1d0] sm:$0xff]  ;;  %v1299_v53 = vld [vmem:[#allocation10 + $0x1b8] sm:$0xff] }
  0xed   : > { %v2208_v57 = vmax.f32 %v758_v52, 0.0  ;;  %915 = vmatmul.f32.vlgmr.msra.gmra.mxu1 %v894_v54  ;;  %938 = vmatmul.f32.vlgmr.msra.gmra.mxu2 %v894_v54  ;;  %v1286_v52 = vld [vmem:[#allocation10 + $0x150] sm:$0xff]  ;;  %v1285_v54 = vld [vmem:[#allocation10 + $0x148] sm:$0xff] }
  0xee   : > { %1159 = vmatpush.msrb.mxu3 %v1150_v55  ;;  %1182 = vmatpush.msra.mxu0 %v1151_v56  ;;  %v1298_v55 = vld [vmem:[#allocation10 + $0x1b0] sm:$0xff]  ;;  %v1284_v56 = vld [vmem:[#allocation10 + $0x140] sm:$0xff] }
  0xef   : > { %v842_v63 = vrot.slane %v2208_v57, 7  ;;  %v895_v2 = vrot.slane %v2208_v57, 6  ;;  %v1063_v16 = vrot.slane %v2208_v57, 1  ;;  %1331 = vmatpush.msra.mxu2 %v1307_v11  ;;  %1308 = vmatpush.msra.mxu1 %v1291_v13  ;;  %v765_v23 = vperm.slane %v2208_v57, 7  ;;  %v1292_v11 = vld [vmem:[#allocation10 + $0x180] sm:$0xff]  ;;  %v1269_v13 = vld [vmem:[#allocation10 + $0xd0] sm:$0xff] }
  0xf0   : > { %1160 = vmatpush.msrb.mxu3 %v1148_v58  ;;  %1183 = vmatpush.msra.mxu0 %v1149_v59  ;;  %v1153_v37 = vrot.slane %v2208_v57, 2  ;;  %v1274_v58 = vld [vmem:[#allocation10 + $0xf8] sm:$0xff] }
  0xf1   : > { %v843_v3 = vsel %vm527_vm2, %v840_v47, %v842_v63  ;;  %v896_v6 = vsel %vm448_vm0, %v893_v51, %v895_v2  ;;  %1332 = vmatpush.msra.mxu2 %v1306_v12  ;;  %v1064_v19 = vsel %vm620_vm3, %v1062_v61, %v1063_v16  ;;  %v1065_v29 = vrot.slane %v765_v23, 1  ;;  %v1289_v47 = vld [vmem:[#allocation10 + $0x168] sm:$0xff]  ;;  %1309 = vmatpush.msra.mxu1 %v1290_v45  ;;  %v1300_v51 = vld [vmem:[#allocation10 + $0x1c0] sm:$0xff]  ;;  %v1283_v59 = vld [vmem:[#allocation10 + $0x138] sm:$0xff] }
  0xf2   : > { %1161 = vmatpush.msrb.mxu3 %v1146_v60  ;;  %1184 = vmatpush.msra.mxu0 %v1147_v62  ;;  %v1154_v41 = vsel %vm670_vm5, %v1152_v40, %v1153_v37  ;;  %v1155_v42 = vrot.slane %v765_v23, 2  ;;  %v1296_v60 = vld [vmem:[#allocation10 + $0x1a0] sm:$0xff]  ;;  %v1273_v62 = vld [vmem:[#allocation10 + $0xf0] sm:$0xff]  ;;  %v1281_v2 = vld [vmem:[#allocation10 + $0x128] sm:$0xff] }
  0xf3   : > { %1333 = vmatpush.msra.mxu2 %v1305_v20  ;;  %v1066_v32 = vsel %vm620_vm3, %v1063_v16, %v1065_v29  ;;  %1310 = vmatpush.msra.mxu1 %v1289_v47  ;;  %v1282_v63 = vld [vmem:[#allocation10 + $0x130] sm:$0xff]  ;;  %v1256_v12 = vld [vmem:[#allocation10 + $0x68] sm:$0xff]  ;;  %v1255_v16 = vld [vmem:[#allocation10 + $0x60] sm:$0xff] }
  0xf4   : > { %1162 = vmatpush.msrb.mxu3 %v1144_v0  ;;  %1185 = vmatpush.msra.mxu0 %v1145_v1  ;;  %v1156_v44 = vsel %vm670_vm5, %v1153_v37, %v1155_v42  ;;  %v1295_v0 = vld [vmem:[#allocation10 + $0x198] sm:$0xff]  ;;  %v1272_v1 = vld [vmem:[#allocation10 + $0xe8] sm:$0xff]  ;;  %v1267_v20 = vld [vmem:[#allocation10 + $0xc0] sm:$0xff] }
  0xf5   : > { %865 = vmatmul.f32.gmra.mxu3 %v843_v3  ;;  %888 = vmatmul.f32.gmra.mxu0 %v843_v3  ;;  %v1294_v3 = vld [vmem:[#allocation10 + $0x190] sm:$0xff]  ;;  %v1268_v61 = vld [vmem:[#allocation10 + $0xc8] sm:$0xff]  ;;  %v1250_v37 = vld [vmem:[#allocation10 + $0x38] sm:$0xff] }
  0xf6   : > { %918 = vmatmul.f32.gmra.mxu1 %v896_v6  ;;  %941 = vmatmul.f32.gmra.mxu2 %v896_v6  ;;  %v1280_v6 = vld [vmem:[#allocation10 + $0x120] sm:$0xff]  ;;  %v1253_v23 = vld [vmem:[#allocation10 + $0x50] sm:$0xff]  ;;  %v1446_v40 = vld [vmem:[#allocation10 + $0x2c8] sm:$0xff] }
  0xf7   : > { %1163 = vmatpush.msrb.mxu3 %v1142_v4  ;;  %1186 = vmatpush.msra.mxu0 %v1143_v5  ;;  %v1258_v4 = vld [vmem:[#allocation10 + $0x78] sm:$0xff]  ;;  %v1271_v5 = vld [vmem:[#allocation10 + $0xe0] sm:$0xff]  ;;  %v1265_v29 = vld [vmem:[#allocation10 + $0xb0] sm:$0xff] }
  0xf8   : > { %1334 = vmatpush.msra.mxu2 %v1304_v24  ;;  %1311 = vmatpush.msra.mxu1 %v1288_v49  ;;  %v1266_v24 = vld [vmem:[#allocation10 + $0xb8] sm:$0xff]  ;;  %v1261_v49 = vld [vmem:[#allocation10 + $0x90] sm:$0xff] }
  0xf9   : > { %1164 = vmatpush.msrb.mxu3 %v1140_v7  ;;  %1187 = vmatpush.msra.mxu0 %v1141_v8  ;;  %v1293_v7 = vld [vmem:[#allocation10 + $0x188] sm:$0xff]  ;;  %v1257_v8 = vld [vmem:[#allocation10 + $0x70] sm:$0xff]  ;;  %v1262_v42 = vld [vmem:[#allocation10 + $0x98] sm:$0xff] }
  0xfa   : > { %1335 = vmatpush.msra.mxu2 %v1303_v46  ;;  %v1432_v45 = vld [vmem:[#allocation10 + $0x258] sm:$0xff]  ;;  %v1445_v46 = vld [vmem:[#allocation10 + $0x2c0] sm:$0xff] }
  0xfb   : > { %1165 = vmatpush.msrb.mxu3 %v1138_v9  ;;  %1188 = vmatpush.msra.mxu0 %v1139_v10  ;;  %v1270_v9 = vld [vmem:[#allocation10 + $0xd8] sm:$0xff] }
  0xfc   : > { %1336 = vmatpush.msra.mxu2 %v1302_v48  ;;  %v1279_v10 = vld [vmem:[#allocation10 + $0x118] sm:$0xff]  ;;  %v1248_v48 = vld [vmem:[#allocation10 + $0x28] sm:$0xff] }
  0xfd   : > { %1166 = vmatpush.msrb.mxu3 %v1136_v14  ;;  %1189 = vmatpush.msra.mxu0 %v1137_v15  ;;  %v1452_v14 = vld [vmem:[#allocation10 + $0x2f8] sm:$0xff]  ;;  %v1278_v15 = vld [vmem:[#allocation10 + $0x110] sm:$0xff] }
  0xfe   : > { %994 = vmatmul.f32.vlgmr.msra.gmra.mxu3 %v2201_v43  ;;  %1017 = vmatmul.f32.vlgmr.msrb.gmra.mxu0 %v2201_v43  ;;  %v1287_v43 = vld [vmem:[#allocation10 + $0x158] sm:$0xff] }
  0xff   : > { %1085 = vmatmul.f32.vlgmr.msrb.gmra.mxu1 %v1064_v19  ;;  %1108 = vmatmul.f32.vlgmr.msrb.gmra.mxu2 %v1064_v19  ;;  %v1254_v19 = vld [vmem:[#allocation10 + $0x58] sm:$0xff] }
 0x100   : > { %1167 = vmatpush.msrb.mxu3 %v1134_v17  ;;  %1190 = vmatpush.msra.mxu0 %v1135_v18  ;;  %v1451_v17 = vld [vmem:[#allocation10 + $0x2f0] sm:$0xff]  ;;  %v1277_v18 = vld [vmem:[#allocation10 + $0x108] sm:$0xff] }
 0x101   : > { %1337 = vmatpush.msra.mxu2 %v1301_v50  ;;  %1312 = vmatpush.msra.mxu1 %v1287_v43  ;;  %v1431_v50 = vld [vmem:[#allocation10 + $0x250] sm:$0xff]  ;;  %v1444_v43 = vld [vmem:[#allocation10 + $0x2b8] sm:$0xff] }
 0x102   : > { %1168 = vmatpush.msrb.mxu3 %v1132_v21  ;;  %1191 = vmatpush.msra.mxu0 %v1133_v22  ;;  %v1450_v21 = vld [vmem:[#allocation10 + $0x2e8] sm:$0xff]  ;;  %v1276_v22 = vld [vmem:[#allocation10 + $0x100] sm:$0xff] }
 0x103   : > { %1338 = vmatpush.msra.mxu2 %v1300_v51  ;;  %1313 = vmatpush.msra.mxu1 %v1286_v52  ;;  %v1247_v51 = vld [vmem:[#allocation10 + $0x20] sm:$0xff]  ;;  %v1260_v52 = vld [vmem:[#allocation10 + $0x88] sm:$0xff] }
 0x104   : > { %1169 = vmatpush.msrb.mxu3 %v1130_v25  ;;  %1192 = vmatpush.msra.mxu0 %v1131_v26  ;;  %v1436_v26 = vld [vmem:[#allocation10 + $0x278] sm:$0xff] }
 0x105   : > { %1339 = vmatpush.msra.mxu2 %v1299_v53  ;;  %1314 = vmatpush.msra.mxu1 %v1285_v54  ;;  %v1430_v53 = vld [vmem:[#allocation10 + $0x248] sm:$0xff]  ;;  %v1443_v54 = vld [vmem:[#allocation10 + $0x2b0] sm:$0xff] }
 0x106   : > { %1170 = vmatpush.msrb.mxu3 %v1128_v27  ;;  %1193 = vmatpush.msra.mxu0 %v1129_v28  ;;  %v1449_v27 = vld [vmem:[#allocation10 + $0x2e0] sm:$0xff]  ;;  %v1252_v28 = vld [vmem:[#allocation10 + $0x48] sm:$0xff] }
 0x107   : > { %997 = vmatmul.f32.gmra.mxu3 %v2208_v57  ;;  %1020 = vmatmul.f32.gmra.mxu0 %v2208_v57  ;;  %v1297_v57 = vld [vmem:[#allocation10 + $0x1a8] sm:$0xff] }
 0x108   : > { %1088 = vmatmul.f32.gmra.mxu1 %v1066_v32  ;;  %1111 = vmatmul.f32.gmra.mxu2 %v1066_v32  ;;  %v1251_v32 = vld [vmem:[#allocation10 + $0x40] sm:$0xff] }
 0x109   : > { %1171 = vmatpush.msrb.mxu3 %v1126_v30  ;;  %1194 = vmatpush.msra.mxu0 %v1127_v31  ;;  %v1435_v30 = vld [vmem:[#allocation10 + $0x270] sm:$0xff]  ;;  %v1448_v31 = vld [vmem:[#allocation10 + $0x2d8] sm:$0xff] }
 0x10a   : > { %1340 = vmatpush.msra.mxu2 %v1298_v55  ;;  %1315 = vmatpush.msra.mxu1 %v1284_v56  ;;  %v1246_v55 = vld [vmem:[#allocation10 + $0x18] sm:$0xff]  ;;  %v1259_v56 = vld [vmem:[#allocation10 + $0x80] sm:$0xff] }
 0x10b   : > { %1172 = vmatpush.msrb.mxu3 %v1124_v33  ;;  %1195 = vmatpush.msra.mxu0 %v1125_v34  ;;  %v1264_v33 = vld [vmem:[#allocation10 + $0xa8] sm:$0xff] }
 0x10c   : > { %1341 = vmatpush.msra.mxu2 %v1297_v57  ;;  %1316 = vmatpush.msra.mxu1 %v1283_v59  ;;  %v1434_v34 = vld [vmem:[#allocation10 + $0x268] sm:$0xff] }
 0x10d   : > { %1173 = vmatpush.msrb.mxu3 %v1122_v35  ;;  %1196 = vmatpush.msra.mxu0 %v1123_v36  ;;  %v1447_v35 = vld [vmem:[#allocation10 + $0x2d0] sm:$0xff]  ;;  %v1442_v59 = vld [vmem:[#allocation10 + $0x2a8] sm:$0xff] }
 0x10e   : > { %1342 = vmatpush.msra.mxu2 %v1296_v60  ;;  %1317 = vmatpush.msra.mxu1 %v1282_v63  ;;  %v1245_v60 = vld [vmem:[#allocation10 + $0x10] sm:$0xff]  ;;  %v1441_v63 = vld [vmem:[#allocation10 + $0x2a0] sm:$0xff] }
 0x10f   : > { %1174 = vmatpush.msrb.mxu3 %v1120_v38  ;;  %1197 = vmatpush.msra.mxu0 %v1121_v39  ;;  %v1263_v38 = vld [vmem:[#allocation10 + $0xa0] sm:$0xff] }
 0x110   : > { %1175 = vmatmul.f32.vlgmr.msrb.gmra.mxu3 %v1154_v41  ;;  %1198 = vmatmul.f32.vlgmr.msra.gmra.mxu0 %v1154_v41  ;;  %v1433_v39 = vld [vmem:[#allocation10 + $0x260] sm:$0xff]  ;;  %v1249_v41 = vld [vmem:[#allocation10 + $0x30] sm:$0xff] }
 0x111   : > { %1397 = vmatpush.msrb.mxu0 %v1274_v58  ;;  %1343 = vmatpush.msra.mxu2 %v1295_v0  ;;  %v1429_v58 = vld [vmem:[#allocation10 + $0x240] sm:$0xff] }
 0x112   : > { %1374 = vmatpush.msra.mxu3 %v1258_v4  ;;  %1318 = vmatpush.msra.mxu1 %v1281_v2  ;;  %v1244_v2 = vld [vmem:[#allocation10 + $0x8] sm:$0xff]  ;;  %v1440_v4 = vld [vmem:[#allocation10 + $0x298] sm:$0xff] }
 0x113   : > { %1398 = vmatpush.msrb.mxu0 %v1273_v62  ;;  %1344 = vmatpush.msra.mxu2 %v1294_v3  ;;  %v1428_v62 = vld [vmem:[#allocation10 + $0x238] sm:$0xff]  ;;  %v1427_v3 = vld [vmem:[#allocation10 + $0x230] sm:$0xff] }
 0x114   : > { %1375 = vmatpush.msra.mxu3 %v1257_v8  ;;  %1319 = vmatpush.msra.mxu1 %v1280_v6  ;;  %v1243_v6 = vld [vmem:[#allocation10] sm:$0xff]  ;;  %v1439_v8 = vld [vmem:[#allocation10 + $0x290] sm:$0xff] }
 0x115   : > { %1399 = vmatpush.msrb.mxu0 %v1272_v1  ;;  %1345 = vmatpush.msra.mxu2 %v1293_v7  ;;  %v1426_v7 = vld [vmem:[#allocation10 + $0x228] sm:$0xff] }
 0x116   : > { %1320 = vmatpush.msra.mxu1 %v1279_v10  ;;  %1376 = vmatpush.msra.mxu3 %v1256_v12  ;;  %v1438_v10 = vld [vmem:[#allocation10 + $0x288] sm:$0xff]  ;;  %v1424_v12 = vld [vmem:[#allocation10 + $0x218] sm:$0xff] }
 0x117   : > { %1400 = vmatpush.msrb.mxu0 %v1271_v5  ;;  %1346 = vmatpush.msra.mxu2 %v1292_v11 }
 0x118   : > { %1178 = vmatmul.f32.gmra.mxu3 %v1156_v44  ;;  %1201 = vmatmul.f32.gmra.mxu0 %v1156_v44 }
 0x119   : > { %1401 = vmatpush.msrb.mxu0 %v1270_v9  ;;  %1492 = vmatpush.msrb.mxu2 %v1452_v14  ;;  %v1425_v9 = vld [vmem:[#allocation10 + $0x220] sm:$0xff] }
 0x11a   : > { %1321 = vmatpush.msra.mxu1 %v1278_v15  ;;  %1377 = vmatpush.msra.mxu3 %v1255_v16  ;;  %v1423_v15 = vld [vmem:[#allocation10 + $0x210] sm:$0xff] }
 0x11b   : > { %1402 = vmatpush.msrb.mxu0 %v1269_v13  ;;  %1493 = vmatpush.msrb.mxu2 %v1451_v17  ;;  %v1437_v13 = vld [vmem:[#allocation10 + $0x280] sm:$0xff] }
 0x11c   : > { %1322 = vmatpush.msra.mxu1 %v1277_v18  ;;  %1378 = vmatpush.msra.mxu3 %v1254_v19  ;;  %v1421_v18 = vld [vmem:[#allocation10 + $0x200] sm:$0xff] }
 0x11d   : > { %1403 = vmatpush.msrb.mxu0 %v1268_v61  ;;  %1494 = vmatpush.msrb.mxu2 %v1450_v21  ;;  %v1422_v61 = vld [vmem:[#allocation10 + $0x208] sm:$0xff] }
 0x11e   : > { %1323 = vmatpush.msra.mxu1 %v1276_v22  ;;  %1379 = vmatpush.msra.mxu3 %v1253_v23 }
 0x11f   : > { %1404 = vmatpush.msrb.mxu0 %v1267_v20  ;;  %1495 = vmatpush.msrb.mxu2 %v1449_v27  ;;  %v1209_v20 = vld [vmem:[%s2275_s4] sm:$0x3] }
 0x120   : > { %1469 = vmatpush.msrb.mxu1 %v1436_v26  ;;  %1380 = vmatpush.msra.mxu3 %v1252_v28  ;;  %v1212_v26 = vperm.slane %v1209_v20, 1 }
 0x121   : > { %1405 = vmatpush.msrb.mxu0 %v1266_v24  ;;  %1496 = vmatpush.msrb.mxu2 %v1448_v31 }
 0x122   : > { %1470 = vmatpush.msrb.mxu1 %v1435_v30  ;;  %1381 = vmatpush.msra.mxu3 %v1251_v32 }
 0x123   : > { %1406 = vmatpush.msrb.mxu0 %v1265_v29  ;;  %1497 = vmatpush.msrb.mxu2 %v1447_v35 }
 0x124   : > { %1471 = vmatpush.msrb.mxu1 %v1434_v34  ;;  %1382 = vmatpush.msra.mxu3 %v1250_v37  ;;  %v1211_v37 = vperm.slane %v1209_v20, 0 }
 0x125   : > { %1407 = vmatpush.msrb.mxu0 %v1264_v33  ;;  %1498 = vmatpush.msrb.mxu2 %v1446_v40 }
 0x126   : > { %1472 = vmatpush.msrb.mxu1 %v1433_v39  ;;  %1383 = vmatpush.msra.mxu3 %v1249_v41  ;;  %v1566_v39 = vld [vmem:[#allocation11 + $0xf0] sm:$0xff] }
 0x127   : > { %1408 = vmatpush.msrb.mxu0 %v1263_v38  ;;  %1499 = vmatpush.msrb.mxu2 %v1445_v46  ;;  %v1567_v38 = vld [vmem:[#allocation11 + $0xf8] sm:$0xff]  ;;  %v1565_v46 = vld [vmem:[#allocation11 + $0xe8] sm:$0xff] }
 0x128   : > { %1473 = vmatpush.msrb.mxu1 %v1432_v45  ;;  %1384 = vmatpush.msra.mxu3 %v1248_v48 }
 0x129   : > { %1409 = vmatpush.msrb.mxu0 %v1262_v42  ;;  %1500 = vmatpush.msrb.mxu2 %v1444_v43 }
 0x12a   : > { %1474 = vmatpush.msrb.mxu1 %v1431_v50  ;;  %1385 = vmatpush.msra.mxu3 %v1247_v51  ;;  %v1564_v51 = vld [vmem:[#allocation11 + $0xe0] sm:$0xff] }
 0x12b   : > { %1410 = vmatpush.msrb.mxu0 %v1261_v49  ;;  %1501 = vmatpush.msrb.mxu2 %v1443_v54 }
 0x12c   : > { %1475 = vmatpush.msrb.mxu1 %v1430_v53  ;;  %1386 = vmatpush.msra.mxu3 %v1246_v55  ;;  %v1563_v55 = vld [vmem:[#allocation11 + $0xd8] sm:$0xff] }
 0x12d   : > { %1411 = vmatpush.msrb.mxu0 %v1260_v52  ;;  %1502 = vmatpush.msrb.mxu2 %v1442_v59 }
 0x12e   : > { %1476 = vmatpush.msrb.mxu1 %v1429_v58  ;;  %1387 = vmatpush.msra.mxu3 %v1245_v60  ;;  %v1562_v60 = vld [vmem:[#allocation11 + $0xd0] sm:$0xff] }
 0x12f   : > { %1412 = vmatpush.msrb.mxu0 %v1259_v56  ;;  %1503 = vmatpush.msrb.mxu2 %v1441_v63 }
 0x130   : > { %1477 = vmatpush.msrb.mxu1 %v1428_v62  ;;  %1388 = vmatpush.msra.mxu3 %v1244_v2 }
 0x131   : > { %1504 = vmatpush.msrb.mxu2 %v1440_v4 }
 0x132   : > { %1478 = vmatpush.msrb.mxu1 %v1427_v3  ;;  %1389 = vmatpush.msra.mxu3 %v1243_v6  ;;  %v1561_v3 = vld [vmem:[#allocation11 + $0xc8] sm:$0xff] }
 0x133   : > { %1505 = vmatpush.msrb.mxu2 %v1439_v8 }
 0x134   : > { %1479 = vmatpush.msrb.mxu1 %v1426_v7  ;;  %1568 = vmatpush.msrb.mxu3 %v1567_v38  ;;  %v1560_v7 = vld [vmem:[#allocation11 + $0xc0] sm:$0xff]  ;;  %v1545_v38 = vld [vmem:[#allocation11 + $0x50] sm:$0xff] }
 0x135   : > { %1506 = vmatpush.msrb.mxu2 %v1438_v10 }
 0x136   : > { %1480 = vmatpush.msrb.mxu1 %v1425_v9  ;;  %1569 = vmatpush.msrb.mxu3 %v1566_v39  ;;  %v1638_v39 = vld [vmem:[#allocation11 + $0x168] sm:$0xff] }
 0x137   : > { %1507 = vmatpush.msrb.mxu2 %v1437_v13 }
 0x138   : > { %1481 = vmatpush.msrb.mxu1 %v1424_v12  ;;  %1570 = vmatpush.msrb.mxu3 %v1565_v46  ;;  %v1635_v46 = vld [vmem:[#allocation11 + $0x150] sm:$0xff] }
 0x13a   : > { %1482 = vmatpush.msrb.mxu1 %v1423_v15  ;;  %1571 = vmatpush.msrb.mxu3 %v1564_v51  ;;  %v1558_v15 = vld [vmem:[#allocation11 + $0xb0] sm:$0xff]  ;;  %v1538_v51 = vld [vmem:[#allocation11 + $0x18] sm:$0xff] }
 0x13c   : > { %1483 = vmatpush.msrb.mxu1 %v1422_v61  ;;  %1572 = vmatpush.msrb.mxu3 %v1563_v55  ;;  %v1536_v55 = vld [vmem:[#allocation11 + $0x8] sm:$0xff] }
 0x13e   : > { %1484 = vmatpush.msrb.mxu1 %v1421_v18  ;;  %1573 = vmatpush.msrb.mxu3 %v1562_v60 }
 0x140   : > { %1574 = vmatpush.msrb.mxu3 %v1561_v3 }
 0x142   : > { %1575 = vmatpush.msrb.mxu3 %v1560_v7 }
 0x169   : > { %v2227_v25 = vpop.f32.mrf.mxu0 }
 0x16a   : > { %v916_v0 = vpop.f32.mrf.mxu1 }
 0x16f   : > { %v2229_v36 = vpop.f32.mrf.mxu3 }
 0x170   : > { %v2233_v47 = vpop.f32.mrf.mxu2  ;;  %v917_v23 = vadd.f32 %v916_v0, %v2229_v36 }
 0x171   : > { %v940_v19 = vadd.f32 %v2233_v47, %v2227_v25 }
 0x172   : > { %v2231_v44 = vpop.f32.mrf.mxu0 }
 0x173   : > { %v919_v16 = vpop.f32.mrf.mxu1 }
 0x178   : > { %v2235_v57 = vpop.f32.mrf.mxu3 }
 0x179   : > { %v942_v5 = vpop.f32.mrf.mxu2  ;;  %v920_v40 = vadd.f32 %v919_v16, %v2235_v57 }
 0x17a   : > { %v943_v31 = vadd.f32 %v942_v5, %v2231_v44 }
 0x17b   : > { %v1018_v1 = vpop.f32.mrf.mxu0 }
 0x17c   : > { %v1025_v21 = vadd.f32 %v1018_v1, %v940_v19  ;;  %v1086_v30 = vpop.f32.mrf.mxu1 }
 0x181   : > { %v995_v11 = vpop.f32.mrf.mxu3 }
 0x182   : > { %v1109_v17 = vpop.f32.mrf.mxu2  ;;  %v1024_v28 = vadd.f32 %v995_v11, %v917_v23  ;;  %v1559_v11 = vld [vmem:[#allocation11 + $0xb8] sm:$0xff] }
 0x183   : > { %v1116_v24 = vadd.f32 %v1109_v17, %v1025_v21  ;;  %1576 = vmatpush.msrb.mxu3 %v1559_v11  ;;  %v1885_v11 = vld [vmem:[%s2277_s6] ss:$0 sm:$0xff] }
 0x184   : > { %v1021_v14 = vpop.f32.mrf.mxu0  ;;  %v1115_v35 = vadd.f32 %v1086_v30, %v1024_v28  ;;  %v1549_v28 = vld [vmem:[#allocation11 + $0x70] sm:$0xff]  ;;  %v1548_v30 = vld [vmem:[#allocation11 + $0x68] sm:$0xff] }
 0x185   : > { %v1027_v33 = vadd.f32 %v1021_v14, %v943_v31  ;;  %v1089_v56 = vpop.f32.mrf.mxu1  ;;  %1577 = vmatpush.msrb.mxu3 %v1558_v15  ;;  %v1554_v31 = vld [vmem:[#allocation11 + $0x90] sm:$0xff] }
 0x18a   : > { %v998_v22 = vpop.f32.mrf.mxu3 }
 0x18b   : > { %v1112_v25 = vpop.f32.mrf.mxu2  ;;  %v1026_v47 = vadd.f32 %v998_v22, %v920_v40  ;;  %v1544_v40 = vld [vmem:[#allocation11 + $0x48] sm:$0xff] }
 0x18c   : > { %v1118_v36 = vadd.f32 %v1112_v25, %v1027_v33  ;;  %v1640_v25 = vld [vmem:[#allocation11 + $0x178] sm:$0xff]  ;;  %v1553_v33 = vld [vmem:[#allocation11 + $0x88] sm:$0xff] }
 0x18d   : > { %v1199_v27 = vpop.f32.mrf.mxu0  ;;  %v1117_v58 = vadd.f32 %v1089_v56, %v1026_v47  ;;  %v1541_v47 = vld [vmem:[#allocation11 + $0x30] sm:$0xff]  ;;  %v1629_v56 = vld [vmem:[#allocation11 + $0x120] sm:$0xff] }
 0x18e   : > { %v1206_v29 = vadd.f32 %v1199_v27, %v1116_v24  ;;  %v1557_v24 = vld [vmem:[#allocation11 + $0xa8] sm:$0xff]  ;;  %v1556_v27 = vld [vmem:[#allocation11 + $0xa0] sm:$0xff] }
 0x18f   : > { %1578 = vmatpush.msrb.mxu3 %v1557_v24 }
 0x190   : > { %v1216_v32 = vadd.f32 %v1212_v26, %v1206_v29  ;;  %v1555_v29 = vld [vmem:[#allocation11 + $0x98] sm:$0xff] }
 0x191   : > { %1579 = vmatpush.msrb.mxu3 %v1556_v27 }
 0x192   : > { %v1220_v34 = vmax.f32 %v1216_v32, 0.0  ;;  %v1547_v32 = vld [vmem:[#allocation11 + $0x60] sm:$0xff] }
 0x193   : > { %v1176_v41 = vpop.f32.mrf.mxu3  ;;  %1580 = vmatpush.msrb.mxu3 %v1555_v29 }
 0x194   : > { %v1205_v42 = vadd.f32 %v1176_v41, %v1115_v35  ;;  %1347 = vmatmul.f32.vlgmr.msra.gmra.mxu2 %v1220_v34  ;;  %v1224_v45 = vperm.slane %v1220_v34, 0  ;;  %v1364_v43 = vrot.slane %v1220_v34, 7  ;;  %v1458_v10 = vrot.slane %v1220_v34, 1  ;;  %v1546_v34 = vld [vmem:[#allocation11 + $0x58] sm:$0xff]  ;;  %v1639_v35 = vld [vmem:[#allocation11 + $0x170] sm:$0xff]  ;;  %v1637_v41 = vld [vmem:[#allocation11 + $0x160] sm:$0xff] }
 0x195   : > { %v1202_v48 = vpop.f32.mrf.mxu0  ;;  %1581 = vmatpush.msrb.mxu3 %v1554_v31 }
 0x196   : > { %v1215_v44 = vadd.f32 %v1211_v37, %v1205_v42  ;;  %v1208_v49 = vadd.f32 %v1202_v48, %v1118_v36  ;;  %v1363_v50 = vrot.slane %v1224_v45, 7  ;;  %v1543_v36 = vld [vmem:[#allocation11 + $0x40] sm:$0xff]  ;;  %v1636_v42 = vld [vmem:[#allocation11 + $0x158] sm:$0xff]  ;;  %v1634_v48 = vld [vmem:[#allocation11 + $0x148] sm:$0xff] }
 0x197   : > { %1582 = vmatpush.msrb.mxu3 %v1553_v33  ;;  %v1542_v45 = vld [vmem:[#allocation11 + $0x38] sm:$0xff] }
 0x198   : > { %v1219_v52 = vmax.f32 %v1215_v44, 0.0  ;;  %v1218_v53 = vadd.f32 %v1212_v26, %v1208_v49  ;;  %v1365_v54 = vsel %vm527_vm2, %v1363_v50, %v1364_v43  ;;  %v1550_v26 = vld [vmem:[#allocation11 + $0x78] sm:$0xff]  ;;  %v1540_v44 = vld [vmem:[#allocation11 + $0x28] sm:$0xff]  ;;  %v1633_v49 = vld [vmem:[#allocation11 + $0x140] sm:$0xff] }
 0x199   : > { %1413 = vmatmul.f32.vlgmr.msrb.gmra.mxu0 %v1365_v54  ;;  %1799 = vmatpush.msra.mxu2 %v1550_v26  ;;  %v1539_v50 = vld [vmem:[#allocation11 + $0x20] sm:$0xff]  ;;  %v1630_v54 = vld [vmem:[#allocation11 + $0x128] sm:$0xff] }
 0x19a   : > { %v1222_v57 = vmax.f32 %v1218_v53, 0.0  ;;  %1324 = vmatmul.f32.vlgmr.msra.gmra.mxu1 %v1219_v52  ;;  %v1223_v59 = vperm.slane %v1219_v52, 0  ;;  %v1361_v1 = vrot.slane %v1219_v52, 7  ;;  %v1455_v17 = vrot.slane %v1219_v52, 1  ;;  %1601 = vmatpush.msra.mxu0 %v1550_v26  ;;  %v1631_v52 = vld [vmem:[#allocation11 + $0x130] sm:$0xff] }
 0x19b   : > { %v1179_v62 = vpop.f32.mrf.mxu3  ;;  %1800 = vmatpush.msra.mxu2 %v1549_v28  ;;  %1649 = vmatpush.msra.mxu1 %v1640_v25  ;;  %v1537_v53 = vld [vmem:[#allocation11 + $0x10] sm:$0xff] }
 0x19c   : > { %v1207_v63 = vadd.f32 %v1179_v62, %v1117_v58  ;;  %1350 = vmatmul.f32.gmra.mxu2 %v1222_v57  ;;  %v1360_v0 = vrot.slane %v1223_v59, 7  ;;  %v1368_v2 = vrot.slane %v1222_v57, 7  ;;  %v1459_v6 = vrot.slane %v1222_v57, 1  ;;  %1602 = vmatpush.msra.mxu0 %v1549_v28  ;;  %v1628_v58 = vld [vmem:[#allocation11 + $0x118] sm:$0xff]  ;;  %v1627_v59 = vld [vmem:[#allocation11 + $0x110] sm:$0xff] }
 0x19d   : > { %v1232_v14 = vperm.slane %v1222_v57, 7  ;;  %1801 = vmatpush.msra.mxu2 %v1548_v30  ;;  %1650 = vmatpush.msra.mxu1 %v1639_v35  ;;  %v1535_v57 = vld [vmem:[#allocation11] sm:$0xff] }
 0x19e   : > { %v1217_v4 = vadd.f32 %v1211_v37, %v1207_v63  ;;  %v1362_v5 = vsel %vm527_vm2, %v1360_v0, %v1361_v1  ;;  %v1369_v9 = vsel %vm527_vm2, %v1364_v43, %v1368_v2  ;;  %v1460_v13 = vsel %vm620_vm3, %v1458_v10, %v1459_v6  ;;  %1603 = vmatpush.msra.mxu0 %v1548_v30  ;;  %v1552_v37 = vld [vmem:[#allocation11 + $0x80] sm:$0xff]  ;;  %v1632_v43 = vld [vmem:[#allocation11 + $0x138] sm:$0xff]  ;;  %v1626_v63 = vld [vmem:[#allocation11 + $0x108] sm:$0xff] }
 0x19f   : > { %1390 = vmatmul.f32.vlgmr.msra.gmra.mxu3 %v1362_v5  ;;  %v1463_v18 = vrot.slane %v1232_v14, 1  ;;  %1802 = vmatpush.msra.mxu2 %v1547_v32  ;;  %v1625_v0 = vld [vmem:[#allocation11 + $0x100] sm:$0xff] }
 0x1a0   : > { %v1221_v8 = vmax.f32 %v1217_v4, 0.0  ;;  %1604 = vmatpush.msra.mxu0 %v1547_v32  ;;  %1583 = vmatpush.msrb.mxu3 %v1552_v37 }
 0x1a1   : > { %1416 = vmatmul.f32.gmra.mxu0 %v1369_v9  ;;  %v1464_v21 = vsel %vm620_vm3, %v1459_v6, %v1463_v18  ;;  %1803 = vmatpush.msra.mxu2 %v1546_v34 }
 0x1a2   : > { %1327 = vmatmul.f32.gmra.mxu1 %v1221_v8  ;;  %v1366_v12 = vrot.slane %v1221_v8, 7  ;;  %v1456_v16 = vrot.slane %v1221_v8, 1  ;;  %v1231_v20 = vperm.slane %v1221_v8, 7  ;;  %1605 = vmatpush.msra.mxu0 %v1546_v34 }
 0x1a3   : > { %1651 = vmatpush.msra.mxu1 %v1638_v39  ;;  %1815 = vmatpush.msra.mxu3 %v1640_v25 }
 0x1a4   : > { %1508 = vmatmul.f32.vlgmr.msrb.gmra.mxu2 %v1460_v13  ;;  %v1367_v61 = vsel %vm527_vm2, %v1361_v1, %v1366_v12  ;;  %v1457_v19 = vsel %vm620_vm3, %v1455_v17, %v1456_v16  ;;  %v1461_v22 = vrot.slane %v1231_v20, 1  ;;  %1606 = vmatpush.msra.mxu0 %v1545_v38 }
 0x1a5   : > { %1804 = vmatpush.msra.mxu2 %v1545_v38  ;;  %1652 = vmatpush.msra.mxu1 %v1637_v41 }
 0x1a6   : > { %v1462_v23 = vsel %vm620_vm3, %v1456_v16, %v1461_v22  ;;  %1607 = vmatpush.msra.mxu0 %v1544_v40  ;;  %1816 = vmatpush.msra.mxu3 %v1639_v35 }
 0x1a7   : > { %1393 = vmatmul.f32.gmra.mxu3 %v1367_v61  ;;  %1805 = vmatpush.msra.mxu2 %v1544_v40 }
 0x1a8   : > { %1608 = vmatpush.msra.mxu0 %v1543_v36  ;;  %1653 = vmatpush.msra.mxu1 %v1636_v42 }
 0x1a9   : > { %1817 = vmatpush.msra.mxu3 %v1638_v39  ;;  %1806 = vmatpush.msra.mxu2 %v1543_v36 }
 0x1aa   : > { %1485 = vmatmul.f32.vlgmr.msrb.gmra.mxu1 %v1457_v19  ;;  %1609 = vmatpush.msra.mxu0 %v1542_v45 }
 0x1ab   : > { %1654 = vmatpush.msra.mxu1 %v1635_v46  ;;  %1818 = vmatpush.msra.mxu3 %v1637_v41  ;;  %v1886_v41 = vld [vmem:[%s2279_s8] ss:$0 sm:$0xff] }
 0x1ac   : > { %1511 = vmatmul.f32.gmra.mxu2 %v1464_v21  ;;  %1610 = vmatpush.msra.mxu0 %v1541_v47 }
 0x1ad   : > { %1807 = vmatpush.msra.mxu2 %v1542_v45  ;;  %1655 = vmatpush.msra.mxu1 %v1634_v48 }
 0x1ae   : > { %1819 = vmatpush.msra.mxu3 %v1636_v42  ;;  %1611 = vmatpush.msra.mxu0 %v1540_v44 }
 0x1af   : > { %1808 = vmatpush.msra.mxu2 %v1541_v47  ;;  %1656 = vmatpush.msra.mxu1 %v1633_v49 }
 0x1b0   : > { %1820 = vmatpush.msra.mxu3 %v1635_v46  ;;  %1612 = vmatpush.msra.mxu0 %v1539_v50 }
 0x1b1   : > { %1809 = vmatpush.msra.mxu2 %v1540_v44  ;;  %1657 = vmatpush.msra.mxu1 %v1632_v43 }
 0x1b2   : > { %1488 = vmatmul.f32.gmra.mxu1 %v1462_v23  ;;  %1821 = vmatpush.msra.mxu3 %v1634_v48 }
 0x1b3   : > { %1613 = vmatpush.msra.mxu0 %v1538_v51  ;;  %1810 = vmatpush.msra.mxu2 %v1539_v50 }
 0x1b4   : > { %1658 = vmatpush.msra.mxu1 %v1631_v52  ;;  %1822 = vmatpush.msra.mxu3 %v1633_v49 }
 0x1b5   : > { %1614 = vmatpush.msra.mxu0 %v1537_v53  ;;  %1811 = vmatpush.msra.mxu2 %v1538_v51 }
 0x1b6   : > { %1659 = vmatpush.msra.mxu1 %v1630_v54  ;;  %1823 = vmatpush.msra.mxu3 %v1632_v43 }
 0x1b7   : > { %1615 = vmatpush.msra.mxu0 %v1536_v55  ;;  %1812 = vmatpush.msra.mxu2 %v1537_v53 }
 0x1b8   : > { %1660 = vmatpush.msra.mxu1 %v1629_v56  ;;  %1824 = vmatpush.msra.mxu3 %v1631_v52 }
 0x1b9   : > { %1616 = vmatpush.msra.mxu0 %v1535_v57  ;;  %1813 = vmatpush.msra.mxu2 %v1536_v55 }
 0x1ba   : > { %1661 = vmatpush.msra.mxu1 %v1628_v58  ;;  %1825 = vmatpush.msra.mxu3 %v1630_v54 }
 0x1bb   : > { %1814 = vmatpush.msra.mxu2 %v1535_v57 }
 0x1bc   : > { %1662 = vmatpush.msra.mxu1 %v1627_v59  ;;  %1826 = vmatpush.msra.mxu3 %v1629_v56 }
 0x1be   : > { %1663 = vmatpush.msra.mxu1 %v1626_v63  ;;  %1827 = vmatpush.msra.mxu3 %v1628_v58 }
 0x1c0   : > { %1664 = vmatpush.msra.mxu1 %v1625_v0  ;;  %1828 = vmatpush.msra.mxu3 %v1627_v59 }
 0x1c2   : > { %1829 = vmatpush.msra.mxu3 %v1626_v63 }
 0x1c4   : > { %1830 = vmatpush.msra.mxu3 %v1625_v0 }
 0x216   : > { %v1414_v5 = vpop.f32.mrf.mxu0 }
 0x217   : > { %v1325_v60 = vpop.f32.mrf.mxu1  ;;  %v1348_v62 = vpop.f32.mrf.mxu2 }
 0x218   : > { %v1349_v3 = vadd.f32 %v1348_v62, %v1325_v60 }
 0x21e   : > { %v1417_v61 = vpop.f32.mrf.mxu0 }
 0x21f   : > { %v1328_v1 = vpop.f32.mrf.mxu1  ;;  %v1351_v2 = vpop.f32.mrf.mxu2 }
 0x220   : > { %v1352_v12 = vadd.f32 %v1351_v2, %v1328_v1 }
 0x222   : > { %v1391_v4 = vpop.f32.mrf.mxu3 }
 0x223   : > { %v1392_v6 = vadd.f32 %v1391_v4, %v1349_v3 }
 0x225   : > { %v1415_v9 = vadd.f32 %v1414_v5, %v1392_v6 }
 0x227   : > { %v1486_v7 = vpop.f32.mrf.mxu1  ;;  %v1509_v8 = vpop.f32.mrf.mxu2 }
 0x228   : > { %v1510_v10 = vadd.f32 %v1509_v8, %v1486_v7 }
 0x22a   : > { %v1515_v13 = vadd.f32 %v1510_v10, %v1415_v9  ;;  %v1394_v14 = vpop.f32.mrf.mxu3 }
 0x22b   : > { %v1395_v16 = vadd.f32 %v1394_v14, %v1352_v12 }
 0x22c   : > { %v1521_v15 = vadd.f32 %v1885_v11, %v1515_v13 }
 0x22d   : > { %v1418_v20 = vadd.f32 %v1417_v61, %v1395_v16 }
 0x22e   : > { %v1523_v17 = vmax.f32 %v1521_v15, 0.0 }
 0x22f   : > { %v1489_v18 = vpop.f32.mrf.mxu1  ;;  %v1512_v19 = vpop.f32.mrf.mxu2 }
 0x230   : > { %v1513_v21 = vadd.f32 %v1512_v19, %v1489_v18  ;;  %1584 = vmatmul.f32.vlgmr.msrb.gmra.mxu3 %v1523_v17  ;;  %v1525_v22 = vperm.slane %v1523_v17, 0  ;;  %v1595_v26 = vrot.slane %v1523_v17, 7  ;;  %v1642_v31 = vrot.slane %v1523_v17, 1 }
 0x232   : > { %v1516_v23 = vadd.f32 %v1513_v21, %v1418_v20  ;;  %v1594_v24 = vrot.slane %v1525_v22, 7 }
 0x234   : > { %v1522_v27 = vadd.f32 %v1885_v11, %v1516_v23  ;;  %v1596_v28 = vsel %vm527_vm2, %v1594_v24, %v1595_v26 }
 0x235   : > { %1617 = vmatmul.f32.vlgmr.msra.gmra.mxu0 %v1596_v28 }
 0x236   : > { %v1524_v29 = vmax.f32 %v1522_v27, 0.0 }
 0x238   : > { %1587 = vmatmul.f32.gmra.mxu3 %v1524_v29  ;;  %v1597_v30 = vrot.slane %v1524_v29, 7  ;;  %v1643_v32 = vrot.slane %v1524_v29, 1  ;;  %v1529_v25 = vperm.slane %v1524_v29, 7 }
 0x23a   : > { %v1598_v33 = vsel %vm527_vm2, %v1595_v26, %v1597_v30  ;;  %v1644_v34 = vsel %vm620_vm3, %v1642_v31, %v1643_v32  ;;  %v1645_v35 = vrot.slane %v1529_v25, 1 }
 0x23b   : > { %1620 = vmatmul.f32.vlgmr.msra.gmra.mxu2 %v1598_v33  ;;  %1665 = vmatmul.f32.vlgmr.msra.gmra.mxu1 %v1644_v34 }
 0x23c   : > { %v1646_v37 = vsel %vm620_vm3, %v1643_v32, %v1645_v35 }
 0x240   : > { %1668 = vmatmul.f32.vlgmr.msra.gmra.mxu3 %v1646_v37 }
 0x2b2   : > { %v1618_v39 = vpop.f32.mrf.mxu0 }
 0x2b3   : > { %v1585_v38 = vpop.f32.mrf.mxu3 }
 0x2b4   : > { %v1619_v40 = vadd.f32 %v1618_v39, %v1585_v38 }
 0x2b8   : > { %v1666_v36 = vpop.f32.mrf.mxu1 }
 0x2b9   : > { %v1672_v42 = vadd.f32 %v1666_v36, %v1619_v40 }
 0x2bb   : > { %v1678_v45 = vadd.f32 %v1886_v41, %v1672_v42  ;;  %v1588_v46 = vpop.f32.mrf.mxu3 }
 0x2bd   : > { %1680 = vst [vmem:[%s399_s15] sm:$0xff] %v1678_v45 }
 0x2be   : > { %v1621_v47 = vpop.f32.mrf.mxu2 }
 0x2bf   : > { %v1622_v48 = vadd.f32 %v1621_v47, %v1588_v46 }
 0x2c3   : > { %v1669_v44 = vpop.f32.mrf.mxu3 }
 0x2c4   : > { %v1673_v49 = vadd.f32 %v1669_v44, %v1622_v48 }
 0x2c6   : > { %v1679_v50 = vadd.f32 %v1886_v41, %v1673_v49 }
 0x2c8   : > { %1681 = vst [vmem:[%s399_s15 + $0x8] sm:$0xff] %v1679_v50 }
 0x2c9 PF: > { %s22_s30 = sadd.s32 1, %s2025_s30  }
 0x2ca   : > { %p19_p7 = scmp.ge.s32.totalorder %s22_s30, 4  }
 0x2cc   :  { %21 = sbr.rel (!%p19_p7) target bundleno = 3 (0x3), region = 117 }
 0x2d1   :  { %1703 = vsyncpa [#allocation7], 1 }
 0x2d2   :  { %1705 = vsyncpa [#allocation7 + $0x1], 1 }
 0x2d3   :  { %1706 = vsyncpa [#allocation9], 1 }
 0x2d4   :  { %1707 = vsyncpa [#allocation12], 1 }

</bundles_post_ra>
